<compile_context>
chip_gen: v5e
topology: v5e:2x2
jax: 0.10.0
libtpu: 0.0.40
codegen_flags: <defaults>
</compile_context>

<pallas_src>
import functools

import jax
import jax.numpy as jnp
import numpy as np
from jax.experimental import pallas as pl
from jax.experimental.pallas import tpu as pltpu

_PACK_W = 128  # lane width of the packed-parameter array


def _elu(x):
    # F.elu with alpha = 1.0
    return jnp.where(x > 0, x, jnp.exp(jnp.minimum(x, 0.0)) - 1.0)


def _default_mxu_dtype():
    """bf16 MXU operands on v6e/v7x (f32 accumulation); f32 elsewhere (v5e has no bf16 VPU/EUP)."""
    try:
        kind = jax.devices()[0].device_kind.lower()
    except Exception:
        return jnp.float32
    if any(tag in kind for tag in ("v6", "v7", "7x")):
        return jnp.bfloat16
    return jnp.float32


# ------------------------------------------------------------------ the fused kernel

def _edp_fused_kernel(adj_ref, adjf_ref, xt_ref, flc_ref, flr_ref, eij_ref,
                      p_ref, out_ref, *, cfg, mxu_dtype):
    bt, n, _ = adj_ref.shape
    nn = n * n

    def P(h):                                   # static slice of the packed-parameter array
        off, r, c = h
        return p_ref[off:off + r, :c]

    def mm(a, b):                               # MXU matmul, f32 accumulation
        return jnp.dot(a.astype(mxu_dtype), b.astype(mxu_dtype),
                       preferred_element_type=jnp.float32)

    # pair one-hot embeddings: e_i[i, i*n+j] = 1, e_j[j, i*n+j] = 1  (constants, loaded once)
    e_i = eij_ref[0:n, :]                       # (n, nn)
    e_j = eij_ref[n:2 * n, :]                   # (n, nn)
    # (ones - eye) score mask, lane-dense; no per-element div/mod
    offdiag = 1.0 - jnp.sum(e_i * e_j, axis=0, keepdims=True)               # (1, nn)

    for g in range(bt):                         # graphs in this batch block (static unroll)
        adj0 = adj_ref[g]                       # (n, n)   raw input adjacency
        adj0f = adjf_ref[g]                     # (1, nn)  same, flattened (pairs on lanes)
        x_t = xt_ref[g]                         # (F0, n)  node features, transposed
        fl_c = flc_ref[g]                       # (n, 1)
        fl_r = flr_ref[g]                       # (1, n)

        pair_mask = fl_c * fl_r                                             # (n, n)
        pmf = mm(fl_r, e_i) * mm(fl_r, e_j)                                 # (1, nn) flat pair mask

        # layer-0 channels: [adj, 1 - adj], node-flag masked; both stacked and flat layouts
        adj_c = jnp.concatenate([adj0[None], (1.0 - adj0)[None]], axis=0) * pair_mask[None]
        adjf = jnp.concatenate([adj0f, 1.0 - adj0f], axis=0) * pmf          # (2, nn)

        # final read-out's first linear layer, folded into the layer loop (no channel concat)
        s = mm(P(cfg["final"]["rw0_t"]), adjf)                              # (Hf, nn)

        for lc in cfg["layers"]:
            # ------- multi-channel GNN (synthetic stand-in, transposed layout) -------
            # TODO(synk): gnn_module_func is an injected dependency in the PyTorch module; a
            # deterministic propagate+linear+ELU GNN over [x | per-channel degrees] is used.
            a_sum_t = jnp.sum(adj_c, axis=0).T                              # (n, n)
            deg = jnp.sum(adj_c, axis=2)                                    # (C_in, n)
            g0 = mm(P(lc["w1x_t"]), x_t) + mm(P(lc["w1d_t"]), deg)          # (H1, n)
            h1 = _elu(g0 + mm(g0, a_sum_t) + P(lc["b1_c"]))
            g1 = mm(P(lc["w2_t"]), h1)                                      # (H2, n)
            h2 = _elu(g1 + mm(g1, a_sum_t) + P(lc["b2_c"]))
            x_t = jnp.tanh(mm(P(lc["w3_t"]), h2) + P(lc["b3_c"])) * fl_r    # (F_out, n)

            # ------- translate MLP over all n*n node pairs, transposed & lane-dense -------
            hi = mm(P(lc["wi_t"]), x_t)                                     # (Hm, n)  x_i part
            hj = mm(P(lc["wj_t"]), x_t)                                     # (Hm, n)  x_j part
            base = (mm(P(lc["wa_t"]), adjf)          # adjacency channels: MXU contraction over C
                    + mm(hi, e_i) + mm(hj, e_j)      # pair broadcasts of x_i / x_j via the MXU
                    + P(lc["mb1_c"]))                                       # (Hm, nn)
            # ConditionalLayer1d (num_classes == 1) modeled as a per-feature affine.
            # TODO(synk): BatchNorm running stats of ConditionalLayer1d folded into (gain, bias).
            hidden = _elu(base * P(lc["gain_c"]) + P(lc["bias_c"]))         # (Hm, nn)
            o = mm(P(lc["mw2_t"]), hidden) + P(lc["mb2_c"])                 # (C_out, nn)

            # out + out^T per channel, then node-flag masking -- exactly the reference order
            o3 = o.reshape(lc["c_out"], n, n)
            syms = [o3[c] + o3[c].T for c in range(lc["c_out"])]
            adj_c = jnp.stack(syms, axis=0) * pair_mask[None]               # (C_out, n, n)
            adjf = adj_c.reshape(lc["c_out"], nn)                           # (C_out, nn)

            # fold this layer's channels into the read-out's first layer
            s = s + mm(P(lc["rw_t"]), adjf)                                 # (Hf, nn)

        # ------- final read-out MLP (3 linear layers, ELU), transposed & lane-dense -------
        fc = cfg["final"]
        h1f = _elu(s + P(fc["fb1_c"]))                                      # (Hf, nn)
        h2f = _elu(mm(P(fc["fw2_t"]), h1f) + P(fc["fb2_c"]))                # (Hf, nn)
        score = mm(P(fc["fw3_t"]), h2f) + P(fc["fb3_c"])                    # (1, nn)
        out_ref[g] = score * offdiag                                        # lane-dense store


# ------------------------------------------------------------------ host-side helpers

def _pair_embed(n):
    """(2n, n*n) one-hot pair embeddings: rows 0..n-1 select the i-node, rows n..2n-1 the j-node."""
    idx = np.arange(n * n)
    rows = np.arange(n)[:, None]
    e_i = (idx[None, :] // n == rows).astype(np.float32)
    e_j = (idx[None, :] % n == rows).astype(np.float32)
    return jnp.asarray(np.concatenate([e_i, e_j], axis=0))


def _pack_params(params):
    """Pack every kernel-ready (pre-transposed) weight into ONE (R, 128) f32 array.

    Returns (packed, cfg) where cfg holds static (row_offset, rows, cols) handles; a single
    full-spec operand replaces ~35 tiny per-weight DMAs / padded double-buffered VMEM blocks.
    """
    state = {"off": 0}
    blocks = []

    def add(a):
        a = jnp.asarray(a, jnp.float32)
        r, c = a.shape
        assert c <= _PACK_W, "packed-parameter width exceeds 128 lanes"
        h = (state["off"], r, c)
        blocks.append(jnp.pad(a, ((0, (-r) % 8), (0, _PACK_W - c))))
        state["off"] += r + ((-r) % 8)          # keep every entry 8-row (sublane) aligned
        return h

    fw1, fb1, fw2, fb2, fw3, fb3 = params["final"]
    layers_cfg = []
    row_off = 2                                  # read-out rows: [2 input channels | layer outputs]
    for lp in params["layers"]:
        w1, b1, w2, b2, w3, b3 = lp["gnn"]
        mw1, mb1, gain, bias, mw2, mb2 = lp["mlp"]
        f_out = w3.shape[1]
        c_out = mw2.shape[1]
        c_in = mw1.shape[0] - 2 * f_out
        f_in = w1.shape[0] - c_in
        layers_cfg.append(dict(
            c_out=c_out,
            w1x_t=add(w1[:f_in].T), w1d_t=add(w1[f_in:].T), b1_c=add(b1.T),
            w2_t=add(w2.T), b2_c=add(b2.T), w3_t=add(w3.T), b3_c=add(b3.T),
            wa_t=add(mw1[:c_in].T), wi_t=add(mw1[c_in:c_in + f_out].T),
            wj_t=add(mw1[c_in + f_out:].T),
            mb1_c=add(mb1.T), gain_c=add(gain.T), bias_c=add(bias.T),
            mw2_t=add(mw2.T), mb2_c=add(mb2.T),
            rw_t=add(fw1[row_off:row_off + c_out].T),
        ))
        row_off += c_out

    final_cfg = dict(rw0_t=add(fw1[0:2].T), fb1_c=add(fb1.T), fw2_t=add(fw2.T),
                     fb2_c=add(fb2.T), fw3_t=add(fw3.T), fb3_c=add(fb3.T))

    packed = jnp.concatenate(blocks, axis=0)
    return packed, {"layers": layers_cfg, "final": final_cfg}


# ------------------------------------------------------------------ full forward

def edp_forward(x, adjs_in, node_flags, params, *, batch_tile=1, mxu_dtype=None):
    """
    x          : (B, N, F0)   node features
    adjs_in    : (B, N, N)    adjacency matrices
    node_flags : (B, N)       node validity flags
    returns    : (B, N, N)    estimated score (diagonal zeroed, as in the reference)
    """
    B, N, F0 = x.shape
    NN = N * N
    assert B % batch_tile == 0
    if mxu_dtype is None:
        mxu_dtype = _default_mxu_dtype()

    packed, cfg = _pack_params(params)
    eij = _pair_embed(N)

    flags = node_flags.astype(jnp.float32)
    x_t = jnp.swapaxes(x, 1, 2).astype(jnp.float32)        # (B, F0, N)  free outside the kernel
    adjs_in = adjs_in.astype(jnp.float32)
    adjs_flat = adjs_in.reshape(B, 1, NN)                  # (B, 1, NN)  free outside the kernel
    fl_col = flags.reshape(B, N, 1)
    fl_row = flags.reshape(B, 1, N)

    kernel = functools.partial(_edp_fused_kernel, cfg=cfg, mxu_dtype=mxu_dtype)

    def _blk(shape):
        return pl.BlockSpec((batch_tile,) + shape, lambda b: (b, 0, 0))

    out = pl.pallas_call(
        kernel,
        out_shape=jax.ShapeDtypeStruct((B, 1, NN), jnp.float32),
        grid=(B // batch_tile,),
        in_specs=[
            _blk((N, N)),                                   # adjacency
            _blk((1, NN)),                                  # adjacency, flattened
            _blk((F0, N)),                                  # node features (transposed)
            _blk((N, 1)),                                   # node flags, column form
            _blk((1, N)),                                   # node flags, row form
            pl.BlockSpec(eij.shape, lambda b: (0, 0)),      # pair one-hot embeddings (constant)
            pl.BlockSpec(packed.shape, lambda b: (0, 0)),   # packed weights (constant)
        ],
        out_specs=_blk((1, NN)),
        compiler_params=pltpu.CompilerParams(
            dimension_semantics=("parallel",),              # megacore / v7x dual-TC sharding
            vmem_limit_bytes=32 * 1024 * 1024,
        ),
    )(adjs_in, adjs_flat, x_t, fl_col, fl_row, eij, packed)
    return out.reshape(B, N, N)


# ------------------------------------------------------------------ deterministic parameter init

def _linear_init(key, fan_in, fan_out):
    k1, k2 = jax.random.split(key)
    bound = 1.0 / np.sqrt(fan_in)
    w = jax.random.uniform(k1, (fan_in, fan_out), minval=-bound, maxval=bound, dtype=jnp.float32)
    b = jax.random.uniform(k2, (1, fan_out), minval=-bound, maxval=bound, dtype=jnp.float32)
    return w, b


def build_params(key, feature_num_list, channel_num_list_arg, gnn_hidden_num_list=(8, 8)):
    channel_num_list = [2] + list(channel_num_list_arg)
    assert len(channel_num_list) == len(feature_num_list)
    layers = []
    for i in range(len(feature_num_list) - 1):
        c_in, c_out = channel_num_list[i], channel_num_list[i + 1]
        f_in, out_dim = feature_num_list[i], feature_num_list[i + 1]
        gnn_feats = [f_in + c_in] + list(gnn_hidden_num_list)

        key, k0, k1, k2 = jax.random.split(key, 4)
        w1, b1 = _linear_init(k0, gnn_feats[0], gnn_feats[1])
        w2, b2 = _linear_init(k1, gnn_feats[1], gnn_feats[2])
        w3, b3 = _linear_init(k2, gnn_feats[2], out_dim)

        d_in = c_in + 2 * out_dim
        hid = max(c_in, c_out) * 2
        key, ka, kb, kc, kd = jax.random.split(key, 5)
        mw1, mb1 = _linear_init(ka, d_in, hid)
        mw2, mb2 = _linear_init(kb, hid, c_out)
        gain = 1.0 + 0.1 * jax.random.normal(kc, (1, hid), dtype=jnp.float32)
        bias = 0.1 * jax.random.normal(kd, (1, hid), dtype=jnp.float32)

        layers.append({"gnn": (w1, b1, w2, b2, w3, b3),
                       "mlp": (mw1, mb1, gain, bias, mw2, mb2)})

    ctot = sum(channel_num_list)
    key, k1, k2, k3 = jax.random.split(key, 4)
    fw1, fb1 = _linear_init(k1, ctot, 2 * ctot)
    fw2, fb2 = _linear_init(k2, 2 * ctot, 2 * ctot)
    fw3, fb3 = _linear_init(k3, 2 * ctot, 1)
    return {"layers": layers, "final": (fw1, fb1, fw2, fb2, fw3, fb3)}


# ------------------------------------------------------------------ main

if __name__ == "__main__":
    key = jax.random.PRNGKey(0)
    B, N = 2, 16                       # N == max_node_number
    feature_num_list = [4, 8, 8]
    channel_num_list = [4, 4]          # arg to __init__ (2 is prepended internally)

    kx, ka, kp = jax.random.split(key, 3)
    x = jax.random.normal(kx, (B, N, feature_num_list[0]), dtype=jnp.float32)
    adj_raw = jax.random.uniform(ka, (B, N, N), dtype=jnp.float32)
    adjs = (adj_raw + jnp.swapaxes(adj_raw, -1, -2)) * 0.5
    adjs = adjs * (1.0 - jnp.eye(N, dtype=jnp.float32))
    node_flags = jnp.ones((B, N), dtype=jnp.float32).at[1, N - 2:].set(0.0)

    params = build_params(kp, feature_num_list, channel_num_list, gnn_hidden_num_list=(8, 8))

    fwd = jax.jit(edp_forward)
    score = jax.block_until_ready(fwd(x, adjs, node_flags, params))

    assert score.shape == (B, N, N)
    assert bool(jnp.all(jnp.isfinite(score)))
    # diagonal must be exactly zero (ones - eye mask)
    assert float(jnp.max(jnp.abs(jnp.diagonal(score, axis1=-2, axis2=-1)))) == 0.0
    print("KERNEL_OK")
</pallas_src>

<mosaic_0001>
module attributes {stable_mosaic.version = 11 : i64} {
  func.func @_edp_fused_kernel(%arg0: i32, %arg1: memref<1x16x16xf32, #tpu.memory_space<vmem>>, %arg2: memref<1x1x256xf32, #tpu.memory_space<vmem>>, %arg3: memref<1x4x16xf32, #tpu.memory_space<vmem>>, %arg4: memref<1x16x1xf32, #tpu.memory_space<vmem>>, %arg5: memref<1x1x16xf32, #tpu.memory_space<vmem>>, %arg6: memref<32x256xf32, #tpu.memory_space<vmem>>, %arg7: memref<400x128xf32, #tpu.memory_space<vmem>>, %arg8: memref<1x1x256xf32, #tpu.memory_space<vmem>>) attributes {dimension_semantics = [#tpu.dimension_semantics<parallel>], iteration_bounds = array<i64: 2>, scalar_prefetch = 0 : i64, scratch_operands = 0 : i64, tpu.core_type = #tpu.core_type<tc>, window_params = [{transform_indices = @transform_0, window_bounds = array<i64: 1, 16, 16>}, {transform_indices = @transform_1, window_bounds = array<i64: 1, 1, 256>}, {transform_indices = @transform_2, window_bounds = array<i64: 1, 4, 16>}, {transform_indices = @transform_3, window_bounds = array<i64: 1, 16, 1>}, {transform_indices = @transform_4, window_bounds = array<i64: 1, 1, 16>}, {pipeline_mode = #tpu.pipeline_mode<synchronous>, transform_indices = @transform_5, window_bounds = array<i64: 32, 256>}, {pipeline_mode = #tpu.pipeline_mode<synchronous>, transform_indices = @transform_6, window_bounds = array<i64: 400, 128>}, {transform_indices = @transform_7, window_bounds = array<i64: 1, 1, 256>}]} {
    %c0 = arith.constant 0 : index
    %c0_0 = arith.constant 0 : index
    %0 = vector.load %arg6[%c0, %c0_0] : memref<32x256xf32, #tpu.memory_space<vmem>>, vector<16x256xf32>
    %c16 = arith.constant 16 : index
    %c0_1 = arith.constant 0 : index
    %1 = vector.load %arg6[%c16, %c0_1] : memref<32x256xf32, #tpu.memory_space<vmem>>, vector<16x256xf32>
    %2 = arith.mulf %0, %1 : vector<16x256xf32>
    %cst = arith.constant dense<0.000000e+00> : vector<256xf32>
    %3 = vector.multi_reduction <add>, %2, %cst [0] : vector<16x256xf32> to vector<256xf32>
    %4 = vector.shape_cast %3 : vector<256xf32> to vector<1x256xf32>
    %cst_2 = arith.constant 1.000000e+00 : f32
    %5 = vector.broadcast %cst_2 : f32 to vector<1x256xf32>
    %6 = arith.subf %5, %4 : vector<1x256xf32>
    %c0_3 = arith.constant 0 : index
    %c0_4 = arith.constant 0 : index
    %c0_5 = arith.constant 0 : index
    %7 = vector.load %arg1[%c0_3, %c0_4, %c0_5] : memref<1x16x16xf32, #tpu.memory_space<vmem>>, vector<1x16x16xf32>
    %8 = vector.shape_cast %7 : vector<1x16x16xf32> to vector<16x16xf32>
    %c0_6 = arith.constant 0 : index
    %c0_7 = arith.constant 0 : index
    %c0_8 = arith.constant 0 : index
    %9 = vector.load %arg2[%c0_6, %c0_7, %c0_8] : memref<1x1x256xf32, #tpu.memory_space<vmem>>, vector<1x1x256xf32>
    %10 = vector.shape_cast %9 : vector<1x1x256xf32> to vector<1x256xf32>
    %c0_9 = arith.constant 0 : index
    %c0_10 = arith.constant 0 : index
    %c0_11 = arith.constant 0 : index
    %11 = vector.load %arg3[%c0_9, %c0_10, %c0_11] : memref<1x4x16xf32, #tpu.memory_space<vmem>>, vector<1x4x16xf32>
    %12 = vector.shape_cast %11 : vector<1x4x16xf32> to vector<4x16xf32>
    %c0_12 = arith.constant 0 : index
    %c0_13 = arith.constant 0 : index
    %c0_14 = arith.constant 0 : index
    %13 = vector.load %arg4[%c0_12, %c0_13, %c0_14] : memref<1x16x1xf32, #tpu.memory_space<vmem>>, vector<1x16x1xf32>
    %14 = vector.shape_cast %13 : vector<1x16x1xf32> to vector<16x1xf32>
    %c0_15 = arith.constant 0 : index
    %c0_16 = arith.constant 0 : index
    %c0_17 = arith.constant 0 : index
    %15 = vector.load %arg5[%c0_15, %c0_16, %c0_17] : memref<1x1x16xf32, #tpu.memory_space<vmem>>, vector<1x1x16xf32>
    %16 = vector.shape_cast %15 : vector<1x1x16xf32> to vector<1x16xf32>
    %17 = vector.broadcast %14 : vector<16x1xf32> to vector<16x16xf32>
    %18 = vector.broadcast %16 : vector<1x16xf32> to vector<16x16xf32>
    %19 = arith.mulf %17, %18 : vector<16x16xf32>
    %cst_18 = arith.constant dense<0.000000e+00> : vector<1x256xf32>
    %20 = tpu.matmul %16, %0, %cst_18 {dimension_numbers = #tpu.dot_dimension_numbers<[1], [0], [0], [1], [0, 0, 1, 1], [], []>} : vector<1x16xf32>, vector<16x256xf32>, vector<1x256xf32> -> vector<1x256xf32>
    %cst_19 = arith.constant dense<0.000000e+00> : vector<1x256xf32>
    %21 = tpu.matmul %16, %1, %cst_19 {dimension_numbers = #tpu.dot_dimension_numbers<[1], [0], [0], [1], [0, 0, 1, 1], [], []>} : vector<1x16xf32>, vector<16x256xf32>, vector<1x256xf32> -> vector<1x256xf32>
    %22 = arith.mulf %20, %21 : vector<1x256xf32>
    %23 = vector.shape_cast %8 : vector<16x16xf32> to vector<1x16x16xf32>
    %cst_20 = arith.constant 1.000000e+00 : f32
    %24 = vector.broadcast %cst_20 : f32 to vector<16x16xf32>
    %25 = arith.subf %24, %8 : vector<16x16xf32>
    %26 = vector.shape_cast %25 : vector<16x16xf32> to vector<1x16x16xf32>
    %27 = tpu.concatenate %23, %26 in 0 : vector<1x16x16xf32>, vector<1x16x16xf32> -> vector<2x16x16xf32>
    %28 = vector.shape_cast %19 : vector<16x16xf32> to vector<1x16x16xf32>
    %29 = vector.broadcast %28 : vector<1x16x16xf32> to vector<2x16x16xf32>
    %30 = arith.mulf %27, %29 : vector<2x16x16xf32>
    %cst_21 = arith.constant 1.000000e+00 : f32
    %31 = vector.broadcast %cst_21 : f32 to vector<1x256xf32>
    %32 = arith.subf %31, %10 : vector<1x256xf32>
    %33 = tpu.concatenate %10, %32 in 0 : vector<1x256xf32>, vector<1x256xf32> -> vector<2x256xf32>
    %34 = vector.broadcast %22 : vector<1x256xf32> to vector<2x256xf32>
    %35 = arith.mulf %33, %34 : vector<2x256xf32>
    %c288 = arith.constant 288 : index
    %c0_22 = arith.constant 0 : index
    %36 = vector.load %arg7[%c288, %c0_22] : memref<400x128xf32, #tpu.memory_space<vmem>>, vector<20x2xf32>
    %cst_23 = arith.constant dense<0.000000e+00> : vector<20x256xf32>
    %37 = tpu.matmul %36, %35, %cst_23 {dimension_numbers = #tpu.dot_dimension_numbers<[1], [0], [0], [1], [0, 0, 1, 1], [], []>} : vector<20x2xf32>, vector<2x256xf32>, vector<20x256xf32> -> vector<20x256xf32>
    %cst_24 = arith.constant dense<0.000000e+00> : vector<16x16xf32>
    %38 = vector.multi_reduction <add>, %30, %cst_24 [0] : vector<2x16x16xf32> to vector<16x16xf32>
    %39 = tpu.transpose %38, [1, 0] : vector<16x16xf32> -> vector<16x16xf32>
    %cst_25 = arith.constant dense<0.000000e+00> : vector<2x16xf32>
    %40 = vector.multi_reduction <add>, %30, %cst_25 [2] : vector<2x16x16xf32> to vector<2x16xf32>
    %c0_26 = arith.constant 0 : index
    %c0_27 = arith.constant 0 : index
    %41 = vector.load %arg7[%c0_26, %c0_27] : memref<400x128xf32, #tpu.memory_space<vmem>>, vector<8x4xf32>
    %cst_28 = arith.constant dense<0.000000e+00> : vector<8x16xf32>
    %42 = tpu.matmul %41, %12, %cst_28 {dimension_numbers = #tpu.dot_dimension_numbers<[1], [0], [0], [1], [0, 0, 1, 1], [], []>} : vector<8x4xf32>, vector<4x16xf32>, vector<8x16xf32> -> vector<8x16xf32>
    %c8 = arith.constant 8 : index
    %c0_29 = arith.constant 0 : index
    %43 = vector.load %arg7[%c8, %c0_29] : memref<400x128xf32, #tpu.memory_space<vmem>>, vector<8x2xf32>
    %cst_30 = arith.constant dense<0.000000e+00> : vector<8x16xf32>
    %44 = tpu.matmul %43, %40, %cst_30 {dimension_numbers = #tpu.dot_dimension_numbers<[1], [0], [0], [1], [0, 0, 1, 1], [], []>} : vector<8x2xf32>, vector<2x16xf32>, vector<8x16xf32> -> vector<8x16xf32>
    %45 = arith.addf %42, %44 : vector<8x16xf32>
    %cst_31 = arith.constant dense<0.000000e+00> : vector<8x16xf32>
    %46 = tpu.matmul %45, %39, %cst_31 {dimension_numbers = #tpu.dot_dimension_numbers<[1], [0], [0], [1], [0, 0, 1, 1], [], []>} : vector<8x16xf32>, vector<16x16xf32>, vector<8x16xf32> -> vector<8x16xf32>
    %47 = arith.addf %45, %46 : vector<8x16xf32>
    %c16_32 = arith.constant 16 : index
    %c0_33 = arith.constant 0 : index
    %48 = vector.load %arg7[%c16_32, %c0_33] : memref<400x128xf32, #tpu.memory_space<vmem>>, vector<8x1xf32>
    %49 = vector.broadcast %48 : vector<8x1xf32> to vector<8x16xf32>
    %50 = arith.addf %47, %49 : vector<8x16xf32>
    %cst_34 = arith.constant 0.000000e+00 : f32
    %51 = vector.broadcast %cst_34 : f32 to vector<8x16xf32>
    %52 = arith.cmpf ogt, %50, %51 : vector<8x16xf32>
    %cst_35 = arith.constant 0.000000e+00 : f32
    %53 = vector.broadcast %cst_35 : f32 to vector<8x16xf32>
    %54 = arith.minimumf %50, %53 : vector<8x16xf32>
    %55 = math.exp %54 : vector<8x16xf32>
    %cst_36 = arith.constant 1.000000e+00 : f32
    %56 = vector.broadcast %cst_36 : f32 to vector<8x16xf32>
    %57 = arith.subf %55, %56 : vector<8x16xf32>
    %58 = arith.select %52, %50, %57 : vector<8x16xi1>, vector<8x16xf32>
    %c24 = arith.constant 24 : index
    %c0_37 = arith.constant 0 : index
    %59 = vector.load %arg7[%c24, %c0_37] : memref<400x128xf32, #tpu.memory_space<vmem>>, vector<8x8xf32>
    %cst_38 = arith.constant dense<0.000000e+00> : vector<8x16xf32>
    %60 = tpu.matmul %59, %58, %cst_38 {dimension_numbers = #tpu.dot_dimension_numbers<[1], [0], [0], [1], [0, 0, 1, 1], [], []>} : vector<8x8xf32>, vector<8x16xf32>, vector<8x16xf32> -> vector<8x16xf32>
    %cst_39 = arith.constant dense<0.000000e+00> : vector<8x16xf32>
    %61 = tpu.matmul %60, %39, %cst_39 {dimension_numbers = #tpu.dot_dimension_numbers<[1], [0], [0], [1], [0, 0, 1, 1], [], []>} : vector<8x16xf32>, vector<16x16xf32>, vector<8x16xf32> -> vector<8x16xf32>
    %62 = arith.addf %60, %61 : vector<8x16xf32>
    %c32 = arith.constant 32 : index
    %c0_40 = arith.constant 0 : index
    %63 = vector.load %arg7[%c32, %c0_40] : memref<400x128xf32, #tpu.memory_space<vmem>>, vector<8x1xf32>
    %64 = vector.broadcast %63 : vector<8x1xf32> to vector<8x16xf32>
    %65 = arith.addf %62, %64 : vector<8x16xf32>
    %cst_41 = arith.constant 0.000000e+00 : f32
    %66 = vector.broadcast %cst_41 : f32 to vector<8x16xf32>
    %67 = arith.cmpf ogt, %65, %66 : vector<8x16xf32>
    %cst_42 = arith.constant 0.000000e+00 : f32
    %68 = vector.broadcast %cst_42 : f32 to vector<8x16xf32>
    %69 = arith.minimumf %65, %68 : vector<8x16xf32>
    %70 = math.exp %69 : vector<8x16xf32>
    %cst_43 = arith.constant 1.000000e+00 : f32
    %71 = vector.broadcast %cst_43 : f32 to vector<8x16xf32>
    %72 = arith.subf %70, %71 : vector<8x16xf32>
    %73 = arith.select %67, %65, %72 : vector<8x16xi1>, vector<8x16xf32>
    %c40 = arith.constant 40 : index
    %c0_44 = arith.constant 0 : index
    %74 = vector.load %arg7[%c40, %c0_44] : memref<400x128xf32, #tpu.memory_space<vmem>>, vector<8x8xf32>
    %cst_45 = arith.constant dense<0.000000e+00> : vector<8x16xf32>
    %75 = tpu.matmul %74, %73, %cst_45 {dimension_numbers = #tpu.dot_dimension_numbers<[1], [0], [0], [1], [0, 0, 1, 1], [], []>} : vector<8x8xf32>, vector<8x16xf32>, vector<8x16xf32> -> vector<8x16xf32>
    %c48 = arith.constant 48 : index
    %c0_46 = arith.constant 0 : index
    %76 = vector.load %arg7[%c48, %c0_46] : memref<400x128xf32, #tpu.memory_space<vmem>>, vector<8x1xf32>
    %77 = vector.broadcast %76 : vector<8x1xf32> to vector<8x16xf32>
    %78 = arith.addf %75, %77 : vector<8x16xf32>
    %79 = math.tanh %78 : vector<8x16xf32>
    %80 = vector.broadcast %16 : vector<1x16xf32> to vector<8x16xf32>
    %81 = arith.mulf %79, %80 : vector<8x16xf32>
    %c64 = arith.constant 64 : index
    %c0_47 = arith.constant 0 : index
    %82 = vector.load %arg7[%c64, %c0_47] : memref<400x128xf32, #tpu.memory_space<vmem>>, vector<8x8xf32>
    %cst_48 = arith.constant dense<0.000000e+00> : vector<8x16xf32>
    %83 = tpu.matmul %82, %81, %cst_48 {dimension_numbers = #tpu.dot_dimension_numbers<[1], [0], [0], [1], [0, 0, 1, 1], [], []>} : vector<8x8xf32>, vector<8x16xf32>, vector<8x16xf32> -> vector<8x16xf32>
    %c72 = arith.constant 72 : index
    %c0_49 = arith.constant 0 : index
    %84 = vector.load %arg7[%c72, %c0_49] : memref<400x128xf32, #tpu.memory_space<vmem>>, vector<8x8xf32>
    %cst_50 = arith.constant dense<0.000000e+00> : vector<8x16xf32>
    %85 = tpu.matmul %84, %81, %cst_50 {dimension_numbers = #tpu.dot_dimension_numbers<[1], [0], [0], [1], [0, 0, 1, 1], [], []>} : vector<8x8xf32>, vector<8x16xf32>, vector<8x16xf32> -> vector<8x16xf32>
    %c56 = arith.constant 56 : index
    %c0_51 = arith.constant 0 : index
    %86 = vector.load %arg7[%c56, %c0_51] : memref<400x128xf32, #tpu.memory_space<vmem>>, vector<8x2xf32>
    %cst_52 = arith.constant dense<0.000000e+00> : vector<8x256xf32>
    %87 = tpu.matmul %86, %35, %cst_52 {dimension_numbers = #tpu.dot_dimension_numbers<[1], [0], [0], [1], [0, 0, 1, 1], [], []>} : vector<8x2xf32>, vector<2x256xf32>, vector<8x256xf32> -> vector<8x256xf32>
    %cst_53 = arith.constant dense<0.000000e+00> : vector<8x256xf32>
    %88 = tpu.matmul %83, %0, %cst_53 {dimension_numbers = #tpu.dot_dimension_numbers<[1], [0], [0], [1], [0, 0, 1, 1], [], []>} : vector<8x16xf32>, vector<16x256xf32>, vector<8x256xf32> -> vector<8x256xf32>
    %89 = arith.addf %87, %88 : vector<8x256xf32>
    %cst_54 = arith.constant dense<0.000000e+00> : vector<8x256xf32>
    %90 = tpu.matmul %85, %1, %cst_54 {dimension_numbers = #tpu.dot_dimension_numbers<[1], [0], [0], [1], [0, 0, 1, 1], [], []>} : vector<8x16xf32>, vector<16x256xf32>, vector<8x256xf32> -> vector<8x256xf32>
    %91 = arith.addf %89, %90 : vector<8x256xf32>
    %c80 = arith.constant 80 : index
    %c0_55 = arith.constant 0 : index
    %92 = vector.load %arg7[%c80, %c0_55] : memref<400x128xf32, #tpu.memory_space<vmem>>, vector<8x1xf32>
    %93 = vector.broadcast %92 : vector<8x1xf32> to vector<8x256xf32>
    %94 = arith.addf %91, %93 : vector<8x256xf32>
    %c88 = arith.constant 88 : index
    %c0_56 = arith.constant 0 : index
    %95 = vector.load %arg7[%c88, %c0_56] : memref<400x128xf32, #tpu.memory_space<vmem>>, vector<8x1xf32>
    %96 = vector.broadcast %95 : vector<8x1xf32> to vector<8x256xf32>
    %97 = arith.mulf %94, %96 : vector<8x256xf32>
    %c96 = arith.constant 96 : index
    %c0_57 = arith.constant 0 : index
    %98 = vector.load %arg7[%c96, %c0_57] : memref<400x128xf32, #tpu.memory_space<vmem>>, vector<8x1xf32>
    %99 = vector.broadcast %98 : vector<8x1xf32> to vector<8x256xf32>
    %100 = arith.addf %97, %99 : vector<8x256xf32>
    %cst_58 = arith.constant 0.000000e+00 : f32
    %101 = vector.broadcast %cst_58 : f32 to vector<8x256xf32>
    %102 = arith.cmpf ogt, %100, %101 : vector<8x256xf32>
    %cst_59 = arith.constant 0.000000e+00 : f32
    %103 = vector.broadcast %cst_59 : f32 to vector<8x256xf32>
    %104 = arith.minimumf %100, %103 : vector<8x256xf32>
    %105 = math.exp %104 : vector<8x256xf32>
    %cst_60 = arith.constant 1.000000e+00 : f32
    %106 = vector.broadcast %cst_60 : f32 to vector<8x256xf32>
    %107 = arith.subf %105, %106 : vector<8x256xf32>
    %108 = arith.select %102, %100, %107 : vector<8x256xi1>, vector<8x256xf32>
    %c104 = arith.constant 104 : index
    %c0_61 = arith.constant 0 : index
    %109 = vector.load %arg7[%c104, %c0_61] : memref<400x128xf32, #tpu.memory_space<vmem>>, vector<4x8xf32>
    %cst_62 = arith.constant dense<0.000000e+00> : vector<4x256xf32>
    %110 = tpu.matmul %109, %108, %cst_62 {dimension_numbers = #tpu.dot_dimension_numbers<[1], [0], [0], [1], [0, 0, 1, 1], [], []>} : vector<4x8xf32>, vector<8x256xf32>, vector<4x256xf32> -> vector<4x256xf32>
    %c112 = arith.constant 112 : index
    %c0_63 = arith.constant 0 : index
    %111 = vector.load %arg7[%c112, %c0_63] : memref<400x128xf32, #tpu.memory_space<vmem>>, vector<4x1xf32>
    %112 = vector.broadcast %111 : vector<4x1xf32> to vector<4x256xf32>
    %113 = arith.addf %110, %112 : vector<4x256xf32>
    %114 = vector.shape_cast %113 : vector<4x256xf32> to vector<4x16x16xf32>
    %115 = vector.extract_strided_slice %114 {offsets = [0, 0, 0], sizes = [1, 16, 16], strides = [1, 1, 1]} : vector<4x16x16xf32> to vector<1x16x16xf32>
    %116 = vector.shape_cast %115 : vector<1x16x16xf32> to vector<16x16xf32>
    %117 = vector.extract_strided_slice %114 {offsets = [0, 0, 0], sizes = [1, 16, 16], strides = [1, 1, 1]} : vector<4x16x16xf32> to vector<1x16x16xf32>
    %118 = vector.shape_cast %117 : vector<1x16x16xf32> to vector<16x16xf32>
    %119 = tpu.transpose %118, [1, 0] : vector<16x16xf32> -> vector<16x16xf32>
    %120 = arith.addf %116, %119 : vector<16x16xf32>
    %121 = vector.extract_strided_slice %114 {offsets = [1, 0, 0], sizes = [1, 16, 16], strides = [1, 1, 1]} : vector<4x16x16xf32> to vector<1x16x16xf32>
    %122 = vector.shape_cast %121 : vector<1x16x16xf32> to vector<16x16xf32>
    %123 = vector.extract_strided_slice %114 {offsets = [1, 0, 0], sizes = [1, 16, 16], strides = [1, 1, 1]} : vector<4x16x16xf32> to vector<1x16x16xf32>
    %124 = vector.shape_cast %123 : vector<1x16x16xf32> to vector<16x16xf32>
    %125 = tpu.transpose %124, [1, 0] : vector<16x16xf32> -> vector<16x16xf32>
    %126 = arith.addf %122, %125 : vector<16x16xf32>
    %127 = vector.extract_strided_slice %114 {offsets = [2, 0, 0], sizes = [1, 16, 16], strides = [1, 1, 1]} : vector<4x16x16xf32> to vector<1x16x16xf32>
    %128 = vector.shape_cast %127 : vector<1x16x16xf32> to vector<16x16xf32>
    %129 = vector.extract_strided_slice %114 {offsets = [2, 0, 0], sizes = [1, 16, 16], strides = [1, 1, 1]} : vector<4x16x16xf32> to vector<1x16x16xf32>
    %130 = vector.shape_cast %129 : vector<1x16x16xf32> to vector<16x16xf32>
    %131 = tpu.transpose %130, [1, 0] : vector<16x16xf32> -> vector<16x16xf32>
    %132 = arith.addf %128, %131 : vector<16x16xf32>
    %133 = vector.extract_strided_slice %114 {offsets = [3, 0, 0], sizes = [1, 16, 16], strides = [1, 1, 1]} : vector<4x16x16xf32> to vector<1x16x16xf32>
    %134 = vector.shape_cast %133 : vector<1x16x16xf32> to vector<16x16xf32>
    %135 = vector.extract_strided_slice %114 {offsets = [3, 0, 0], sizes = [1, 16, 16], strides = [1, 1, 1]} : vector<4x16x16xf32> to vector<1x16x16xf32>
    %136 = vector.shape_cast %135 : vector<1x16x16xf32> to vector<16x16xf32>
    %137 = tpu.transpose %136, [1, 0] : vector<16x16xf32> -> vector<16x16xf32>
    %138 = arith.addf %134, %137 : vector<16x16xf32>
    %139 = vector.shape_cast %120 : vector<16x16xf32> to vector<1x16x16xf32>
    %140 = vector.shape_cast %126 : vector<16x16xf32> to vector<1x16x16xf32>
    %141 = vector.shape_cast %132 : vector<16x16xf32> to vector<1x16x16xf32>
    %142 = vector.shape_cast %138 : vector<16x16xf32> to vector<1x16x16xf32>
    %143 = tpu.concatenate %139, %140, %141, %142 in 0 : vector<1x16x16xf32>, vector<1x16x16xf32>, vector<1x16x16xf32>, vector<1x16x16xf32> -> vector<4x16x16xf32>
    %144 = vector.shape_cast %19 : vector<16x16xf32> to vector<1x16x16xf32>
    %145 = vector.broadcast %144 : vector<1x16x16xf32> to vector<4x16x16xf32>
    %146 = arith.mulf %143, %145 : vector<4x16x16xf32>
    %147 = vector.shape_cast %146 : vector<4x16x16xf32> to vector<4x256xf32>
    %c120 = arith.constant 120 : index
    %c0_64 = arith.constant 0 : index
    %148 = vector.load %arg7[%c120, %c0_64] : memref<400x128xf32, #tpu.memory_space<vmem>>, vector<20x4xf32>
    %cst_65 = arith.constant dense<0.000000e+00> : vector<20x256xf32>
    %149 = tpu.matmul %148, %147, %cst_65 {dimension_numbers = #tpu.dot_dimension_numbers<[1], [0], [0], [1], [0, 0, 1, 1], [], []>} : vector<20x4xf32>, vector<4x256xf32>, vector<20x256xf32> -> vector<20x256xf32>
    %150 = arith.addf %37, %149 : vector<20x256xf32>
    %cst_66 = arith.constant dense<0.000000e+00> : vector<16x16xf32>
    %151 = vector.multi_reduction <add>, %146, %cst_66 [0] : vector<4x16x16xf32> to vector<16x16xf32>
    %152 = tpu.transpose %151, [1, 0] : vector<16x16xf32> -> vector<16x16xf32>
    %cst_67 = arith.constant dense<0.000000e+00> : vector<4x16xf32>
    %153 = vector.multi_reduction <add>, %146, %cst_67 [2] : vector<4x16x16xf32> to vector<4x16xf32>
    %c144 = arith.constant 144 : index
    %c0_68 = arith.constant 0 : index
    %154 = vector.load %arg7[%c144, %c0_68] : memref<400x128xf32, #tpu.memory_space<vmem>>, vector<8x8xf32>
    %cst_69 = arith.constant dense<0.000000e+00> : vector<8x16xf32>
    %155 = tpu.matmul %154, %81, %cst_69 {dimension_numbers = #tpu.dot_dimension_numbers<[1], [0], [0], [1], [0, 0, 1, 1], [], []>} : vector<8x8xf32>, vector<8x16xf32>, vector<8x16xf32> -> vector<8x16xf32>
    %c152 = arith.constant 152 : index
    %c0_70 = arith.constant 0 : index
    %156 = vector.load %arg7[%c152, %c0_70] : memref<400x128xf32, #tpu.memory_space<vmem>>, vector<8x4xf32>
    %cst_71 = arith.constant dense<0.000000e+00> : vector<8x16xf32>
    %157 = tpu.matmul %156, %153, %cst_71 {dimension_numbers = #tpu.dot_dimension_numbers<[1], [0], [0], [1], [0, 0, 1, 1], [], []>} : vector<8x4xf32>, vector<4x16xf32>, vector<8x16xf32> -> vector<8x16xf32>
    %158 = arith.addf %155, %157 : vector<8x16xf32>
    %cst_72 = arith.constant dense<0.000000e+00> : vector<8x16xf32>
    %159 = tpu.matmul %158, %152, %cst_72 {dimension_numbers = #tpu.dot_dimension_numbers<[1], [0], [0], [1], [0, 0, 1, 1], [], []>} : vector<8x16xf32>, vector<16x16xf32>, vector<8x16xf32> -> vector<8x16xf32>
    %160 = arith.addf %158, %159 : vector<8x16xf32>
    %c160 = arith.constant 160 : index
    %c0_73 = arith.constant 0 : index
    %161 = vector.load %arg7[%c160, %c0_73] : memref<400x128xf32, #tpu.memory_space<vmem>>, vector<8x1xf32>
    %162 = vector.broadcast %161 : vector<8x1xf32> to vector<8x16xf32>
    %163 = arith.addf %160, %162 : vector<8x16xf32>
    %cst_74 = arith.constant 0.000000e+00 : f32
    %164 = vector.broadcast %cst_74 : f32 to vector<8x16xf32>
    %165 = arith.cmpf ogt, %163, %164 : vector<8x16xf32>
    %cst_75 = arith.constant 0.000000e+00 : f32
    %166 = vector.broadcast %cst_75 : f32 to vector<8x16xf32>
    %167 = arith.minimumf %163, %166 : vector<8x16xf32>
    %168 = math.exp %167 : vector<8x16xf32>
    %cst_76 = arith.constant 1.000000e+00 : f32
    %169 = vector.broadcast %cst_76 : f32 to vector<8x16xf32>
    %170 = arith.subf %168, %169 : vector<8x16xf32>
    %171 = arith.select %165, %163, %170 : vector<8x16xi1>, vector<8x16xf32>
    %c168 = arith.constant 168 : index
    %c0_77 = arith.constant 0 : index
    %172 = vector.load %arg7[%c168, %c0_77] : memref<400x128xf32, #tpu.memory_space<vmem>>, vector<8x8xf32>
    %cst_78 = arith.constant dense<0.000000e+00> : vector<8x16xf32>
    %173 = tpu.matmul %172, %171, %cst_78 {dimension_numbers = #tpu.dot_dimension_numbers<[1], [0], [0], [1], [0, 0, 1, 1], [], []>} : vector<8x8xf32>, vector<8x16xf32>, vector<8x16xf32> -> vector<8x16xf32>
    %cst_79 = arith.constant dense<0.000000e+00> : vector<8x16xf32>
    %174 = tpu.matmul %173, %152, %cst_79 {dimension_numbers = #tpu.dot_dimension_numbers<[1], [0], [0], [1], [0, 0, 1, 1], [], []>} : vector<8x16xf32>, vector<16x16xf32>, vector<8x16xf32> -> vector<8x16xf32>
    %175 = arith.addf %173, %174 : vector<8x16xf32>
    %c176 = arith.constant 176 : index
    %c0_80 = arith.constant 0 : index
    %176 = vector.load %arg7[%c176, %c0_80] : memref<400x128xf32, #tpu.memory_space<vmem>>, vector<8x1xf32>
    %177 = vector.broadcast %176 : vector<8x1xf32> to vector<8x16xf32>
    %178 = arith.addf %175, %177 : vector<8x16xf32>
    %cst_81 = arith.constant 0.000000e+00 : f32
    %179 = vector.broadcast %cst_81 : f32 to vector<8x16xf32>
    %180 = arith.cmpf ogt, %178, %179 : vector<8x16xf32>
    %cst_82 = arith.constant 0.000000e+00 : f32
    %181 = vector.broadcast %cst_82 : f32 to vector<8x16xf32>
    %182 = arith.minimumf %178, %181 : vector<8x16xf32>
    %183 = math.exp %182 : vector<8x16xf32>
    %cst_83 = arith.constant 1.000000e+00 : f32
    %184 = vector.broadcast %cst_83 : f32 to vector<8x16xf32>
    %185 = arith.subf %183, %184 : vector<8x16xf32>
    %186 = arith.select %180, %178, %185 : vector<8x16xi1>, vector<8x16xf32>
    %c184 = arith.constant 184 : index
    %c0_84 = arith.constant 0 : index
    %187 = vector.load %arg7[%c184, %c0_84] : memref<400x128xf32, #tpu.memory_space<vmem>>, vector<8x8xf32>
    %cst_85 = arith.constant dense<0.000000e+00> : vector<8x16xf32>
    %188 = tpu.matmul %187, %186, %cst_85 {dimension_numbers = #tpu.dot_dimension_numbers<[1], [0], [0], [1], [0, 0, 1, 1], [], []>} : vector<8x8xf32>, vector<8x16xf32>, vector<8x16xf32> -> vector<8x16xf32>
    %c192 = arith.constant 192 : index
    %c0_86 = arith.constant 0 : index
    %189 = vector.load %arg7[%c192, %c0_86] : memref<400x128xf32, #tpu.memory_space<vmem>>, vector<8x1xf32>
    %190 = vector.broadcast %189 : vector<8x1xf32> to vector<8x16xf32>
    %191 = arith.addf %188, %190 : vector<8x16xf32>
    %192 = math.tanh %191 : vector<8x16xf32>
    %193 = vector.broadcast %16 : vector<1x16xf32> to vector<8x16xf32>
    %194 = arith.mulf %192, %193 : vector<8x16xf32>
    %c208 = arith.constant 208 : index
    %c0_87 = arith.constant 0 : index
    %195 = vector.load %arg7[%c208, %c0_87] : memref<400x128xf32, #tpu.memory_space<vmem>>, vector<8x8xf32>
    %cst_88 = arith.constant dense<0.000000e+00> : vector<8x16xf32>
    %196 = tpu.matmul %195, %194, %cst_88 {dimension_numbers = #tpu.dot_dimension_numbers<[1], [0], [0], [1], [0, 0, 1, 1], [], []>} : vector<8x8xf32>, vector<8x16xf32>, vector<8x16xf32> -> vector<8x16xf32>
    %c216 = arith.constant 216 : index
    %c0_89 = arith.constant 0 : index
    %197 = vector.load %arg7[%c216, %c0_89] : memref<400x128xf32, #tpu.memory_space<vmem>>, vector<8x8xf32>
    %cst_90 = arith.constant dense<0.000000e+00> : vector<8x16xf32>
    %198 = tpu.matmul %197, %194, %cst_90 {dimension_numbers = #tpu.dot_dimension_numbers<[1], [0], [0], [1], [0, 0, 1, 1], [], []>} : vector<8x8xf32>, vector<8x16xf32>, vector<8x16xf32> -> vector<8x16xf32>
    %c200 = arith.constant 200 : index
    %c0_91 = arith.constant 0 : index
    %199 = vector.load %arg7[%c200, %c0_91] : memref<400x128xf32, #tpu.memory_space<vmem>>, vector<8x4xf32>
    %cst_92 = arith.constant dense<0.000000e+00> : vector<8x256xf32>
    %200 = tpu.matmul %199, %147, %cst_92 {dimension_numbers = #tpu.dot_dimension_numbers<[1], [0], [0], [1], [0, 0, 1, 1], [], []>} : vector<8x4xf32>, vector<4x256xf32>, vector<8x256xf32> -> vector<8x256xf32>
    %cst_93 = arith.constant dense<0.000000e+00> : vector<8x256xf32>
    %201 = tpu.matmul %196, %0, %cst_93 {dimension_numbers = #tpu.dot_dimension_numbers<[1], [0], [0], [1], [0, 0, 1, 1], [], []>} : vector<8x16xf32>, vector<16x256xf32>, vector<8x256xf32> -> vector<8x256xf32>
    %202 = arith.addf %200, %201 : vector<8x256xf32>
    %cst_94 = arith.constant dense<0.000000e+00> : vector<8x256xf32>
    %203 = tpu.matmul %198, %1, %cst_94 {dimension_numbers = #tpu.dot_dimension_numbers<[1], [0], [0], [1], [0, 0, 1, 1], [], []>} : vector<8x16xf32>, vector<16x256xf32>, vector<8x256xf32> -> vector<8x256xf32>
    %204 = arith.addf %202, %203 : vector<8x256xf32>
    %c224 = arith.constant 224 : index
    %c0_95 = arith.constant 0 : index
    %205 = vector.load %arg7[%c224, %c0_95] : memref<400x128xf32, #tpu.memory_space<vmem>>, vector<8x1xf32>
    %206 = vector.broadcast %205 : vector<8x1xf32> to vector<8x256xf32>
    %207 = arith.addf %204, %206 : vector<8x256xf32>
    %c232 = arith.constant 232 : index
    %c0_96 = arith.constant 0 : index
    %208 = vector.load %arg7[%c232, %c0_96] : memref<400x128xf32, #tpu.memory_space<vmem>>, vector<8x1xf32>
    %209 = vector.broadcast %208 : vector<8x1xf32> to vector<8x256xf32>
    %210 = arith.mulf %207, %209 : vector<8x256xf32>
    %c240 = arith.constant 240 : index
    %c0_97 = arith.constant 0 : index
    %211 = vector.load %arg7[%c240, %c0_97] : memref<400x128xf32, #tpu.memory_space<vmem>>, vector<8x1xf32>
    %212 = vector.broadcast %211 : vector<8x1xf32> to vector<8x256xf32>
    %213 = arith.addf %210, %212 : vector<8x256xf32>
    %cst_98 = arith.constant 0.000000e+00 : f32
    %214 = vector.broadcast %cst_98 : f32 to vector<8x256xf32>
    %215 = arith.cmpf ogt, %213, %214 : vector<8x256xf32>
    %cst_99 = arith.constant 0.000000e+00 : f32
    %216 = vector.broadcast %cst_99 : f32 to vector<8x256xf32>
    %217 = arith.minimumf %213, %216 : vector<8x256xf32>
    %218 = math.exp %217 : vector<8x256xf32>
    %cst_100 = arith.constant 1.000000e+00 : f32
    %219 = vector.broadcast %cst_100 : f32 to vector<8x256xf32>
    %220 = arith.subf %218, %219 : vector<8x256xf32>
    %221 = arith.select %215, %213, %220 : vector<8x256xi1>, vector<8x256xf32>
    %c248 = arith.constant 248 : index
    %c0_101 = arith.constant 0 : index
    %222 = vector.load %arg7[%c248, %c0_101] : memref<400x128xf32, #tpu.memory_space<vmem>>, vector<4x8xf32>
    %cst_102 = arith.constant dense<0.000000e+00> : vector<4x256xf32>
    %223 = tpu.matmul %222, %221, %cst_102 {dimension_numbers = #tpu.dot_dimension_numbers<[1], [0], [0], [1], [0, 0, 1, 1], [], []>} : vector<4x8xf32>, vector<8x256xf32>, vector<4x256xf32> -> vector<4x256xf32>
    %c256 = arith.constant 256 : index
    %c0_103 = arith.constant 0 : index
    %224 = vector.load %arg7[%c256, %c0_103] : memref<400x128xf32, #tpu.memory_space<vmem>>, vector<4x1xf32>
    %225 = vector.broadcast %224 : vector<4x1xf32> to vector<4x256xf32>
    %226 = arith.addf %223, %225 : vector<4x256xf32>
    %227 = vector.shape_cast %226 : vector<4x256xf32> to vector<4x16x16xf32>
    %228 = vector.extract_strided_slice %227 {offsets = [0, 0, 0], sizes = [1, 16, 16], strides = [1, 1, 1]} : vector<4x16x16xf32> to vector<1x16x16xf32>
    %229 = vector.shape_cast %228 : vector<1x16x16xf32> to vector<16x16xf32>
    %230 = vector.extract_strided_slice %227 {offsets = [0, 0, 0], sizes = [1, 16, 16], strides = [1, 1, 1]} : vector<4x16x16xf32> to vector<1x16x16xf32>
    %231 = vector.shape_cast %230 : vector<1x16x16xf32> to vector<16x16xf32>
    %232 = tpu.transpose %231, [1, 0] : vector<16x16xf32> -> vector<16x16xf32>
    %233 = arith.addf %229, %232 : vector<16x16xf32>
    %234 = vector.extract_strided_slice %227 {offsets = [1, 0, 0], sizes = [1, 16, 16], strides = [1, 1, 1]} : vector<4x16x16xf32> to vector<1x16x16xf32>
    %235 = vector.shape_cast %234 : vector<1x16x16xf32> to vector<16x16xf32>
    %236 = vector.extract_strided_slice %227 {offsets = [1, 0, 0], sizes = [1, 16, 16], strides = [1, 1, 1]} : vector<4x16x16xf32> to vector<1x16x16xf32>
    %237 = vector.shape_cast %236 : vector<1x16x16xf32> to vector<16x16xf32>
    %238 = tpu.transpose %237, [1, 0] : vector<16x16xf32> -> vector<16x16xf32>
    %239 = arith.addf %235, %238 : vector<16x16xf32>
    %240 = vector.extract_strided_slice %227 {offsets = [2, 0, 0], sizes = [1, 16, 16], strides = [1, 1, 1]} : vector<4x16x16xf32> to vector<1x16x16xf32>
    %241 = vector.shape_cast %240 : vector<1x16x16xf32> to vector<16x16xf32>
    %242 = vector.extract_strided_slice %227 {offsets = [2, 0, 0], sizes = [1, 16, 16], strides = [1, 1, 1]} : vector<4x16x16xf32> to vector<1x16x16xf32>
    %243 = vector.shape_cast %242 : vector<1x16x16xf32> to vector<16x16xf32>
    %244 = tpu.transpose %243, [1, 0] : vector<16x16xf32> -> vector<16x16xf32>
    %245 = arith.addf %241, %244 : vector<16x16xf32>
    %246 = vector.extract_strided_slice %227 {offsets = [3, 0, 0], sizes = [1, 16, 16], strides = [1, 1, 1]} : vector<4x16x16xf32> to vector<1x16x16xf32>
    %247 = vector.shape_cast %246 : vector<1x16x16xf32> to vector<16x16xf32>
    %248 = vector.extract_strided_slice %227 {offsets = [3, 0, 0], sizes = [1, 16, 16], strides = [1, 1, 1]} : vector<4x16x16xf32> to vector<1x16x16xf32>
    %249 = vector.shape_cast %248 : vector<1x16x16xf32> to vector<16x16xf32>
    %250 = tpu.transpose %249, [1, 0] : vector<16x16xf32> -> vector<16x16xf32>
    %251 = arith.addf %247, %250 : vector<16x16xf32>
    %252 = vector.shape_cast %233 : vector<16x16xf32> to vector<1x16x16xf32>
    %253 = vector.shape_cast %239 : vector<16x16xf32> to vector<1x16x16xf32>
    %254 = vector.shape_cast %245 : vector<16x16xf32> to vector<1x16x16xf32>
    %255 = vector.shape_cast %251 : vector<16x16xf32> to vector<1x16x16xf32>
    %256 = tpu.concatenate %252, %253, %254, %255 in 0 : vector<1x16x16xf32>, vector<1x16x16xf32>, vector<1x16x16xf32>, vector<1x16x16xf32> -> vector<4x16x16xf32>
    %257 = vector.shape_cast %19 : vector<16x16xf32> to vector<1x16x16xf32>
    %258 = vector.broadcast %257 : vector<1x16x16xf32> to vector<4x16x16xf32>
    %259 = arith.mulf %256, %258 : vector<4x16x16xf32>
    %260 = vector.shape_cast %259 : vector<4x16x16xf32> to vector<4x256xf32>
    %c264 = arith.constant 264 : index
    %c0_104 = arith.constant 0 : index
    %261 = vector.load %arg7[%c264, %c0_104] : memref<400x128xf32, #tpu.memory_space<vmem>>, vector<20x4xf32>
    %cst_105 = arith.constant dense<0.000000e+00> : vector<20x256xf32>
    %262 = tpu.matmul %261, %260, %cst_105 {dimension_numbers = #tpu.dot_dimension_numbers<[1], [0], [0], [1], [0, 0, 1, 1], [], []>} : vector<20x4xf32>, vector<4x256xf32>, vector<20x256xf32> -> vector<20x256xf32>
    %263 = arith.addf %150, %262 : vector<20x256xf32>
    %c312 = arith.constant 312 : index
    %c0_106 = arith.constant 0 : index
    %264 = vector.load %arg7[%c312, %c0_106] : memref<400x128xf32, #tpu.memory_space<vmem>>, vector<20x1xf32>
    %265 = vector.broadcast %264 : vector<20x1xf32> to vector<20x256xf32>
    %266 = arith.addf %263, %265 : vector<20x256xf32>
    %cst_107 = arith.constant 0.000000e+00 : f32
    %267 = vector.broadcast %cst_107 : f32 to vector<20x256xf32>
    %268 = arith.cmpf ogt, %266, %267 : vector<20x256xf32>
    %cst_108 = arith.constant 0.000000e+00 : f32
    %269 = vector.broadcast %cst_108 : f32 to vector<20x256xf32>
    %270 = arith.minimumf %266, %269 : vector<20x256xf32>
    %271 = math.exp %270 : vector<20x256xf32>
    %cst_109 = arith.constant 1.000000e+00 : f32
    %272 = vector.broadcast %cst_109 : f32 to vector<20x256xf32>
    %273 = arith.subf %271, %272 : vector<20x256xf32>
    %274 = arith.select %268, %266, %273 : vector<20x256xi1>, vector<20x256xf32>
    %c336 = arith.constant 336 : index
    %c0_110 = arith.constant 0 : index
    %275 = vector.load %arg7[%c336, %c0_110] : memref<400x128xf32, #tpu.memory_space<vmem>>, vector<20x20xf32>
    %cst_111 = arith.constant dense<0.000000e+00> : vector<20x256xf32>
    %276 = tpu.matmul %275, %274, %cst_111 {dimension_numbers = #tpu.dot_dimension_numbers<[1], [0], [0], [1], [0, 0, 1, 1], [], []>} : vector<20x20xf32>, vector<20x256xf32>, vector<20x256xf32> -> vector<20x256xf32>
    %c360 = arith.constant 360 : index
    %c0_112 = arith.constant 0 : index
    %277 = vector.load %arg7[%c360, %c0_112] : memref<400x128xf32, #tpu.memory_space<vmem>>, vector<20x1xf32>
    %278 = vector.broadcast %277 : vector<20x1xf32> to vector<20x256xf32>
    %279 = arith.addf %276, %278 : vector<20x256xf32>
    %cst_113 = arith.constant 0.000000e+00 : f32
    %280 = vector.broadcast %cst_113 : f32 to vector<20x256xf32>
    %281 = arith.cmpf ogt, %279, %280 : vector<20x256xf32>
    %cst_114 = arith.constant 0.000000e+00 : f32
    %282 = vector.broadcast %cst_114 : f32 to vector<20x256xf32>
    %283 = arith.minimumf %279, %282 : vector<20x256xf32>
    %284 = math.exp %283 : vector<20x256xf32>
    %cst_115 = arith.constant 1.000000e+00 : f32
    %285 = vector.broadcast %cst_115 : f32 to vector<20x256xf32>
    %286 = arith.subf %284, %285 : vector<20x256xf32>
    %287 = arith.select %281, %279, %286 : vector<20x256xi1>, vector<20x256xf32>
    %c384 = arith.constant 384 : index
    %c0_116 = arith.constant 0 : index
    %288 = vector.load %arg7[%c384, %c0_116] : memref<400x128xf32, #tpu.memory_space<vmem>>, vector<1x20xf32>
    %cst_117 = arith.constant dense<0.000000e+00> : vector<1x256xf32>
    %289 = tpu.matmul %288, %287, %cst_117 {dimension_numbers = #tpu.dot_dimension_numbers<[1], [0], [0], [1], [0, 0, 1, 1], [], []>} : vector<1x20xf32>, vector<20x256xf32>, vector<1x256xf32> -> vector<1x256xf32>
    %c392 = arith.constant 392 : index
    %c0_118 = arith.constant 0 : index
    %290 = vector.load %arg7[%c392, %c0_118] : memref<400x128xf32, #tpu.memory_space<vmem>>, vector<1x1xf32>
    %291 = vector.broadcast %290 : vector<1x1xf32> to vector<1x256xf32>
    %292 = arith.addf %289, %291 : vector<1x256xf32>
    %293 = arith.mulf %292, %6 : vector<1x256xf32>
    %c0_119 = arith.constant 0 : index
    %c0_120 = arith.constant 0 : index
    %c0_121 = arith.constant 0 : index
    %294 = vector.load %arg8[%c0_119, %c0_120, %c0_121] : memref<1x1x256xf32, #tpu.memory_space<vmem>>, vector<1x1x256xf32>
    %295 = vector.shape_cast %294 : vector<1x1x256xf32> to vector<1x256xf32>
    %296 = vector.shape_cast %293 : vector<1x256xf32> to vector<1x1x256xf32>
    tpu.vector_store %arg8[%c0_119, %c0_120, %c0_121], %296 {strides = array<i32>} : memref<1x1x256xf32, #tpu.memory_space<vmem>>, vector<1x1x256xf32>,
    return
  }
  func.func @transform_0(%arg0: i32) -> (i32, i32, i32) {
    %c0_i32 = arith.constant 0 : i32
    %c0_i32_0 = arith.constant 0 : i32
    %c0_i32_1 = arith.constant 0 : i32
    return %arg0, %c0_i32, %c0_i32_0 : i32, i32, i32
  }
  func.func @transform_1(%arg0: i32) -> (i32, i32, i32) {
    %c0_i32 = arith.constant 0 : i32
    %c0_i32_0 = arith.constant 0 : i32
    %c0_i32_1 = arith.constant 0 : i32
    return %arg0, %c0_i32, %c0_i32_0 : i32, i32, i32
  }
  func.func @transform_2(%arg0: i32) -> (i32, i32, i32) {
    %c0_i32 = arith.constant 0 : i32
    %c0_i32_0 = arith.constant 0 : i32
    %c0_i32_1 = arith.constant 0 : i32
    return %arg0, %c0_i32, %c0_i32_0 : i32, i32, i32
  }
  func.func @transform_3(%arg0: i32) -> (i32, i32, i32) {
    %c0_i32 = arith.constant 0 : i32
    %c0_i32_0 = arith.constant 0 : i32
    %c0_i32_1 = arith.constant 0 : i32
    return %arg0, %c0_i32, %c0_i32_0 : i32, i32, i32
  }
  func.func @transform_4(%arg0: i32) -> (i32, i32, i32) {
    %c0_i32 = arith.constant 0 : i32
    %c0_i32_0 = arith.constant 0 : i32
    %c0_i32_1 = arith.constant 0 : i32
    return %arg0, %c0_i32, %c0_i32_0 : i32, i32, i32
  }
  func.func @transform_5(%arg0: i32) -> (i32, i32) {
    %c0_i32 = arith.constant 0 : i32
    %c0_i32_0 = arith.constant 0 : i32
    %c0_i32_1 = arith.constant 0 : i32
    return %c0_i32, %c0_i32_0 : i32, i32
  }
  func.func @transform_6(%arg0: i32) -> (i32, i32) {
    %c0_i32 = arith.constant 0 : i32
    %c0_i32_0 = arith.constant 0 : i32
    %c0_i32_1 = arith.constant 0 : i32
    return %c0_i32, %c0_i32_0 : i32, i32
  }
  func.func @transform_7(%arg0: i32) -> (i32, i32, i32) {
    %c0_i32 = arith.constant 0 : i32
    %c0_i32_0 = arith.constant 0 : i32
    %c0_i32_1 = arith.constant 0 : i32
    return %arg0, %c0_i32, %c0_i32_0 : i32, i32, i32
  }
}

</mosaic_0001>

<bundles_post_ra>
// kernel: edp_forward.1
= control target key start
LH: loop header
LB: loop body
LE: loop exit
PB: predicated region body
PF: predicated region fallthrough
CT: control target
= control target key end

     0   :  { %s3298_s24 = smov 0   ;;  %s4079_s0 = inlined_call_operand.vmem [shape: f32[2,16,16], index: 0, kind: input, shape index: {}]   ;;  %s4080_s1 = inlined_call_operand.vmem [shape: f32[2,1,256], index: 1, kind: input, shape index: {}]   ;;  %s4081_s2 = inlined_call_operand.vmem [shape: f32[2,4,16], index: 2, kind: input, shape index: {}]   ;;  %s4082_s3 = inlined_call_operand.vmem [shape: f32[2,16,1], index: 3, kind: input, shape index: {}]   ;;  %s4083_s4 = inlined_call_operand.vmem [shape: f32[2,1,16], index: 4, kind: input, shape index: {}]   ;;  %s4084_s5 = inlined_call_operand.vmem [shape: f32[32,256], index: 5, kind: input, shape index: {}]   ;;  %s4085_s6 = inlined_call_operand.vmem [shape: f32[400,128], index: 6, kind: input, shape index: {}]   ;;  %s4086_s7 = inlined_call_operand.vmem [shape: f32[2,1,256], index: 7, kind: output, shape index: {}]  }
   0x1 LB: > { %s3039_s25 = sadd.s32 4294967295, %s3246_s24   ;;  %p3043_p0 = scmp.ge.s32.totalorder %s3246_s24, 1  ;;  %s3246_s24 = sphi %s3298_s24, %s17_s24  }
   0x2   : > { %p273_p1 = scmp.lt.s32.totalorder %s3246_s24, 3 }
   0x4   : > { %p274_p2 = pnand %p3043_p0, %p273_p1 }
   0x5   : > { %p320_p3 = scmp.lt.s32.totalorder (!%p274_p2), %s3039_s25, 1  ;;  %s3250_s30 = smov (!%p274_p2), 80  }
   0x6   : > { %277 = sbr.rel (%p274_p2) target bundleno = 3998 (0xf9e), region = 48  ;;  %s3251_s8 = smov (!%p274_p2), 96  }
   0x7   : > { %s3252_s9 = smov (!%p274_p2), 64   ;;  %s3253_s10 = smov (!%p274_p2), 112  }
   0x8   : > { %s3254_s11 = smov (!%p274_p2), 16   ;;  %s3255_s12 = smov (!%p274_p2), 48  }
   0xb   : > { %v3248_v0 = vmov 0   ;;  %s4088_s25 = smov (!%p320_p3, %s3039_s25), 1  ;;  %v624_v3 = vld [vmem:[%s4085_s6 + $0x10] sm:$0xff]  ;;  %v925_v5 = vld [vmem:[%s4085_s6 + $0x58] sm:$0xff]  ;;  %v933_v6 = vld [vmem:[%s4085_s6 + $0x60] sm:$0xff]  ;;  %vm395_vm0 = vcmask 130048   ;;  %v527_v37 = vlaneseq }
   0xc   : > { %3181 = vset.pattern.permute.xlu0 %v3248_v0  ;;  %3182 = vset.pattern.permute.xlu1 %v3248_v0  ;;  %s3160_s26 = sshll.u32 %s4088_s25, 4  ;;  %v917_v4 = vld [vmem:[%s4085_s6 + $0x50] sm:$0xff]  ;;  %s3334_s19 = scalar_lea.vmem %s4083_s4, %s4088_s25  ;;  %v3340_v9 = vld [vmem:[%s4084_s5 + $0x20] sm:$0xff]  ;;  %v3360_v22 = vld [vmem:[%s4084_s5 + $0x38] sm:$0xff]  ;;  %vm570_vm1 = vcmask 1043456   ;;  %vm566_vm2 = vcmask 31744  }
   0xd   : > { %3183 = vset.pattern.permute.xlu2 %v3248_v0  ;;  %s337_s29 = scalar_lea.vmem %s4082_s3, %s3160_s26  ;;  %v3327_v7 = vld [vmem:[%s4084_s5 + $0x30] sm:$0xff]  ;;  %v379_v8 = vld [vmem:[%s3334_s19] sm:$0x1]  ;;  %s324_s27 = scalar_lea.vmem %s4079_s0, %s3160_s26  ;;  %v3365_v23 = vld [vmem:[%s4084_s5 + $0x28] sm:$0xff]  ;;  %472 = vmatpush.msra.mxu3 %v3360_v22  ;;  %v3409_v40 = vand.u32 127, %v527_v37  ;;  %vm532_vm3 = vcmask 130112  }
   0xe   : > { %v377_v1 = vld [vmem:[%s337_s29] sm:$0xff]  ;;  %v378_v2 = vld [vmem:[%s337_s29 + $0x8] sm:$0xff]  ;;  %452 = vmatpush.msra.mxu2 %v3327_v7  ;;  %v347_v31 = vld [vmem:[%s4084_s5 + $0x10] sm:$0xff]  ;;  %s3047_s16 = sshll.u32 %s4088_s25, 2  ;;  %vm537_vm4 = vcmask 1041409   ;;  %vm543_vm5 = vcmask 1041408  }
   0xf   : > { %382 = vperm.xlu0 %3181, %v377_v1   ;;  %v373_v10 = vld [vmem:[%s324_s27] sm:$0xff]  ;;  %v374_v17 = vld [vmem:[%s324_s27 + $0x8] sm:$0xff]  ;;  %473 = vmatpush.msra.mxu3 %v3365_v23  ;;  %v3385_v32 = vld [vmem:[%s4084_s5 + $0x18] sm:$0xff]  ;;  %s332_s20 = scalar_lea.vmem %s4081_s2, %s3047_s16  ;;  %v3412_v41 = vadd.s32 4294967288, %v3409_v40  ;;  %vm539_vm6 = vcmask 15360   ;;  %vm638_vm8 = vcmask 64512  }
  0x10   : > { %453 = vmatpush.msra.mxu2 %v3340_v9  ;;  %v3348_v11 = vld [vmem:[%s3334_s19] ss:$0 sm:$0xff]  ;;  %v480_v12 = vsub.f32 1.0, %v373_v10  ;;  %v481_v20 = vsub.f32 1.0, %v374_v17  ;;  %3054 = vmatmul.msk.f32.vlgmr.msra.gmra.mxu3 %vm395_vm0, %v379_v8  ;;  %v3394_v34 = vld [vmem:[%s4084_s5 + $0x8] sm:$0xff]  ;;  %s3046_s14 = sshll.u32 %s4088_s25, 1 }
  0x11   : > { %3053 = vmatmul.msk.f32.vlgmr.msra.gmra.mxu2 %vm395_vm0, %v379_v8  ;;  %v345_v33 = vld [vmem:[%s4084_s5] sm:$0xff]  ;;  %412 = vmatpush.msra.mxu0 %v347_v31  ;;  %v522_v50 = vld [vmem:[%s4085_s6 + $0x8] sm:$0xff]  ;;  %s328_s17 = scalar_lea.vmem %s4080_s1, %s3046_s14  ;;  %vm497_vm10 = vcmask 1040384   ;;  %s3249_s29 = smov 32   ;;  %vm1048_vm13 = vcmask 1047556   ;;  %vm1473_vm14 = vcmask 261120  }
  0x12   : > { %432 = vmatpush.msra.mxu1 %v3385_v32  ;;  %v376_v35 = vld [vmem:[%s332_s20] sm:$0xf]  ;;  %vm1475_vm15 = vcmask 392192   ;;  %s344_s18 = scalar_lea.vmem %s4086_s7, %s3046_s14 }
  0x13   : > { %413 = vmatpush.msra.mxu0 %v345_v33  ;;  %v521_v36 = vld [vmem:[%s4085_s6] sm:$0xff] }
  0x14   : > { %433 = vmatpush.msra.mxu1 %v3394_v34  ;;  %3051 = vmatmul.msk.f32.vlgmr.msra.gmra.mxu0 %vm395_vm0, %v379_v8 }
  0x15   : > { %3052 = vmatmul.msk.f32.vlgmr.msra.gmra.mxu1 %vm395_vm0, %v379_v8  ;;  %v700_v8 = vld [vmem:[%s4085_s6 + $0x30] sm:$0xff] }
  0x16   : > { %3057 = vmatpush.msk.msrb.mxu1 %vm570_vm1, %v376_v35 }
  0x17   : > { %387 = vperm.xlu0 %3181, %v378_v2   ;;  %v637_v2 = vld [vmem:[%s4085_s6 + $0x18] sm:$0xff] }
  0x1d   : > { %3058 = vmatmul.msk.f32.vlgmr.msrb.gmra.mxu1 %vm566_vm2, %v521_v36 }
  0x1f   : > { %627 = vperm.xlu0 %3181, %v624_v3  }
  0x27   : > { %920 = vperm.xlu0 %3181, %v917_v4   ;;  %v686_v4 = vld [vmem:[%s4085_s6 + $0x20] sm:$0xff] }
  0x2f   : > { %928 = vperm.xlu0 %3181, %v925_v5  }
  0x37   : > { %936 = vperm.xlu0 %3181, %v933_v6  }
  0x81   : > { %v383_v13 = vpop.permute.xlu0 %382 }
  0x82   : > { %v3351_v14 = vmul.f32 %v3348_v11, %v383_v13 }
  0x84   : > { %v482_v15 = vmul.f32 %v3351_v14, %v373_v10  ;;  %v484_v16 = vmul.f32 %v480_v12, %v3351_v14  ;;  %v954_v10 = vld [vmem:[%s4085_s6 + $0x70] sm:$0xf] }
  0x86   : > { %v507_v18 = vsel %vm395_vm0, %v482_v15, 0.0  ;;  %v508_v19 = vsel %vm395_vm0, %v484_v16, 0.0 }
  0x87   : > { %513 = vadd.xlane.f32.xlu1 %v507_v18  ;;  %517 = vadd.xlane.f32.xlu2 %v508_v19  ;;  %v509_v30 = vadd.f32 %v508_v19, %v507_v18  ;;  %v699_v19 = vld [vmem:[%s4085_s6 + $0x28] sm:$0xff] }
  0x89   : > { %v388_v21 = vpop.permute.xlu0 %387 }
  0x8a   : > { %v3368_v24 = vmul.f32 %v3348_v11, %v388_v21  ;;  %v375_v21 = vld [vmem:[%s328_s17] sm:$0x3] }
  0x8c   : > { %v483_v25 = vmul.f32 %v3368_v24, %v374_v17  ;;  %v485_v26 = vmul.f32 %v481_v20, %v3368_v24 }
  0x8e   : > { %v510_v27 = vsel %vm395_vm0, %v483_v25, 0.0  ;;  %v511_v28 = vsel %vm395_vm0, %v485_v26, 0.0  ;;  %v486_v25 = vsub.f32 1.0, %v375_v21 }
  0x8f   : > { %515 = vadd.xlane.f32.xlu1 %v510_v27  ;;  %v512_v29 = vadd.f32 %v511_v28, %v510_v27  ;;  %519 = vadd.xlane.f32.xlu2 %v511_v28 }
  0x91   : > { %3059 = vmatpush.xpose.msk.msrb.mxu2 %vm395_vm0, %v512_v29  ;;  %v415_v53 = vpop.f32.mrf.mxu0  ;;  %v628_v60 = vpop.permute.xlu0 %627 }
  0x92   : > { %v435_v52 = vpop.f32.mrf.mxu1 }
  0x93   : > { %v475_v5 = vpop.f32.mrf.mxu3 }
  0x94   : > { %v455_v57 = vpop.f32.mrf.mxu2 }
  0x95   : > { %3060 = vmatpush.xpose.msk.msrb.mxu2 %vm395_vm0, %v509_v30 }
  0x9a   : > { %v591_v54 = vpop.f32.mrf.mxu1 }
  0xa7   : > { %703 = vperm.xlu2 %3183, %v700_v8  }
  0xa8   : > { %689 = vperm.xlu1 %3182, %v686_v4  }
  0xaf   : > { %957 = vperm.xlu2 %3183, %v954_v10  }
  0xfa   : > { %v514_v38 = vpop.xlane.xlu1 %513  ;;  %v518_v39 = vpop.xlane.xlu2 %517 }
  0xfb   : > { %v529_v44 = vperm.slane %v514_v38, %v3409_v40  ;;  %v534_v45 = vperm.slane %v518_v39, %v3409_v40 }
 0x102   : > { %v516_v42 = vpop.xlane.xlu1 %515  ;;  %v520_v43 = vpop.xlane.xlu2 %519 }
 0x103   : > { %v531_v46 = vperm.slane %v516_v42, %v3412_v41  ;;  %v535_v47 = vperm.slane %v520_v43, %v3412_v41  ;;  %v731_v42 = vld [vmem:[%s4085_s6 + $0x40] sm:$0xff] }
 0x105   : > { %v533_v48 = vsel %vm532_vm3, %v531_v46, %v529_v44  ;;  %v536_v49 = vsel %vm532_vm3, %v535_v47, %v534_v45  ;;  %v755_v44 = vld [vmem:[%s4085_s6 + $0x48] sm:$0xff] }
 0x106   : > { %v538_v51 = vsel %vm537_vm4, %v536_v49, %v533_v48  ;;  %v921_v48 = vpop.permute.xlu0 %920 }
 0x107   : > { %3055 = vmatpush.msk.msrb.mxu0 %vm543_vm5, %v538_v51 }
 0x108   : > { %3056 = vmatmul.msk.f32.vlgmr.msrb.gmra.mxu0 %vm539_vm6, %v522_v50 }
 0x109   : > { %3064 = vmatpush.xpose.msk.msra.mxu0 %vm395_vm0, %v512_v29  ;;  %v479_v29 = vmul.f32 %v475_v5, %v435_v52 }
 0x10a   : > { %v704_v26 = vpop.permute.xlu2 %703 }
 0x10d   : > { %3065 = vmatpush.xpose.msk.msra.mxu0 %vm395_vm0, %v509_v30  ;;  %v478_v30 = vmul.f32 %v455_v57, %v415_v53 }
 0x10e   : > { %v929_v51 = vpop.permute.xlu0 %928 }
 0x111   : > { %797 = vmatpush.msrb.mxu0 %v347_v31  ;;  %v489_v31 = vperm.slane %v375_v21, 1 }
 0x113   : > { %798 = vmatpush.msrb.mxu0 %v345_v33  ;;  %v488_v33 = vperm.slane %v375_v21, 0 }
 0x11a   : > { %v690_v13 = vpop.permute.xlu1 %689 }
 0x185   : > { %v563_v55 = vpop.f32.mrf.mxu0 }
 0x186   : > { %v592_v56 = vadd.f32 %v591_v54, %v563_v55 }
 0x188   : > { %3061 = vmatmul.msk.f32.vlgmr.msrb.gmra.mxu2 %vm395_vm0, %v592_v56 }
 0x20b   : > { %v620_v58 = vpop.f32.mrf.mxu2 }
 0x20c   : > { %v623_v59 = vadd.f32 %v620_v58, %v592_v56 }
 0x20e   : > { %v630_v61 = vadd.f32 %v628_v60, %v623_v59 }
 0x210   : > { %v632_v62 = vmin.f32 %v630_v61, 0.0  ;;  %vm631_vm7 = vcmp.gt.f32.partialorder %v630_v61, 0.0 }
 0x212   : > { %v633_v63 = vmul.f32 1.442695, %v632_v62 }
 0x214   : > { %3185 = vpow2.f32 %v633_v63 }
 0x21a   : > { %v3186_v0 = vpop.eup %3185 }
 0x21b   : > { %v3062_v1 = vadd.f32 -1.0, %v3186_v0  ;;  %v937_v0 = vpop.permute.xlu0 %936 }
 0x21d   : > { %v636_v3 = vsel %vm631_vm7, %v630_v61, %v3062_v1  ;;  %vm1481_vm7 = vcmask 785408  }
 0x21e   : > { %657 = vmatpush.msrb.mxu3 %v636_v3 }
 0x21f   : > { %3063 = vmatmul.msk.f32.vlgmr.msrb.gmra.mxu3 %vm638_vm8, %v637_v2 }
 0x2a2   : > { %v659_v6 = vpop.f32.mrf.mxu3 }
 0x2a3   : > { %3066 = vmatmul.msk.f32.vlgmr.msra.gmra.mxu0 %vm395_vm0, %v659_v6 }
 0x2a4   : > { %889 = vmatpush.msra.mxu0 %v3327_v7 }
 0x2a6   : > { %890 = vmatpush.msra.mxu0 %v3340_v9 }
 0x320   : > { %v682_v12 = vpop.f32.mrf.mxu0 }
 0x321   : > { %v685_v15 = vadd.f32 %v682_v12, %v659_v6 }
 0x323   : > { %v692_v16 = vadd.f32 %v690_v13, %v685_v15  ;;  %v953_v15 = vld [vmem:[%s4085_s6 + $0x68] sm:$0xf] }
 0x325   : > { %v694_v17 = vmin.f32 %v692_v16, 0.0  ;;  %vm693_vm9 = vcmp.gt.f32.partialorder %v692_v16, 0.0 }
 0x327   : > { %v695_v7 = vmul.f32 1.442695, %v694_v17 }
 0x329   : > { %3187 = vpow2.f32 %v695_v7  ;;  %v958_v7 = vpop.permute.xlu2 %957 }
 0x32f   : > { %v3188_v9 = vpop.eup %3187 }
 0x330   : > { %v3067_v18 = vadd.f32 -1.0, %v3188_v9 }
 0x332   : > { %v698_v20 = vsel %vm693_vm9, %v692_v16, %v3067_v18  ;;  %vm1483_vm9 = vcmask 916480  }
 0x333   : > { %724 = vmatpush.msra.mxu1 %v698_v20 }
 0x334   : > { %3068 = vmatmul.msk.f32.vlgmr.msra.gmra.mxu1 %vm638_vm8, %v699_v19 }
 0x335   : > { %817 = vmatpush.msrb.mxu1 %v3385_v32  ;;  %v494_v32 = vperm.slane %v486_v25, 1 }
 0x337   : > { %818 = vmatpush.msrb.mxu1 %v3394_v34  ;;  %v500_v34 = vperm.slane %v478_v30, 0  ;;  %v499_v35 = vsel %vm497_vm10, %v489_v31, %v494_v32  ;;  %v3256_v31 = vmov 1983009808  }
 0x338   : > { %v1051_v32 = vunpack.c.l.s4 %v3256_v31 }
 0x339   : > { %909 = vmatpush.msra.mxu1 %v3360_v22  ;;  %v493_v22 = vperm.slane %v486_v25, 0 }
 0x33b   : > { %910 = vmatpush.msra.mxu1 %v3365_v23  ;;  %v501_v23 = vperm.slane %v479_v29, 0  ;;  %v498_v38 = vsel %vm497_vm10, %v488_v33, %v493_v22 }
 0x33c   : > { %v502_v45 = vmul.f32 %v500_v34, %v498_v38  ;;  %v3508_v34 = vunpack.c.0.s8 %v1051_v32 }
 0x33d   : > { %v503_v43 = vmul.f32 %v501_v23, %v499_v35 }
 0x3b1   : > { %v726_v27 = vpop.f32.mrf.mxu1 }
 0x3b2   : > { %v727_v28 = vadd.f32 %v726_v27, %v704_v26 }
 0x3b4   : > { %3189 = vtanh.f32 %v727_v28 }
 0x3ba   : > { %v3190_v36 = vpop.eup %3189 }
 0x3bb   : > { %v3462_v39 = vmul.f32 %v3190_v36, %v3348_v11  ;;  %v779_v11 = vld [vmem:[%s4085_s6 + $0x38] sm:$0xff] }
 0x3bd   : > { %750 = vmatpush.msra.mxu2 %v3462_v39  ;;  %774 = vmatpush.msra.mxu3 %v3462_v39 }
 0x3be   : > { %3069 = vmatmul.msk.f32.vlgmr.msra.gmra.mxu2 %vm638_vm8, %v731_v42  ;;  %3070 = vmatmul.msk.f32.vlgmr.msra.gmra.mxu3 %vm638_vm8, %v755_v44 }
 0x3bf   : > { %3075 = vmatpush.msk.msrb.mxu3 %vm543_vm5, %v503_v43  ;;  %3073 = vmatpush.msk.msrb.mxu2 %vm543_vm5, %v502_v45 }
 0x3c6   : > { %3074 = vmatmul.msk.f32.vlgmr.msrb.gmra.mxu2 %vm539_vm6, %v779_v11  ;;  %3076 = vmatmul.msk.f32.vlgmr.msrb.gmra.mxu3 %vm539_vm6, %v779_v11 }
 0x441   : > { %v752_v46 = vpop.f32.mrf.mxu2  ;;  %v776_v47 = vpop.f32.mrf.mxu3 }
 0x442   : > { %3071 = vmatmul.msk.f32.vlgmr.msrb.gmra.mxu0 %vm395_vm0, %v752_v46  ;;  %3072 = vmatmul.msk.f32.vlgmr.msrb.gmra.mxu1 %vm395_vm0, %v752_v46 }
 0x449   : > { %v849_v52 = vpop.f32.mrf.mxu2  ;;  %v869_v53 = vpop.f32.mrf.mxu3 }
 0x44a   : > { %3077 = vmatmul.msk.f32.vlgmr.msra.gmra.mxu0 %vm395_vm0, %v776_v47  ;;  %3078 = vmatmul.msk.f32.vlgmr.msra.gmra.mxu1 %vm395_vm0, %v776_v47 }
 0x4bf   : > { %v800_v49 = vpop.f32.mrf.mxu0  ;;  %v820_v50 = vpop.f32.mrf.mxu1 }
 0x4c0   : > { %v850_v54 = vadd.f32 %v849_v52, %v800_v49  ;;  %v870_v55 = vadd.f32 %v869_v53, %v820_v50 }
 0x4c7   : > { %v892_v56 = vpop.f32.mrf.mxu0  ;;  %v912_v57 = vpop.f32.mrf.mxu1 }
 0x4c8   : > { %v915_v58 = vadd.f32 %v892_v56, %v850_v54  ;;  %v916_v59 = vadd.f32 %v912_v57, %v870_v55 }
 0x4ca   : > { %v923_v60 = vadd.f32 %v921_v48, %v915_v58  ;;  %v924_v61 = vadd.f32 %v921_v48, %v916_v59 }
 0x4cc   : > { %v931_v62 = vmul.f32 %v929_v51, %v923_v60  ;;  %v932_v63 = vmul.f32 %v929_v51, %v924_v61 }
 0x4ce   : > { %v939_v1 = vadd.f32 %v937_v0, %v931_v62  ;;  %v940_v2 = vadd.f32 %v937_v0, %v932_v63 }
 0x4d0   : > { %v943_v3 = vmin.f32 %v939_v1, 0.0  ;;  %v944_v4 = vmin.f32 %v940_v2, 0.0  ;;  %vm941_vm11 = vcmp.gt.f32.partialorder %v939_v1, 0.0  ;;  %vm942_vm12 = vcmp.gt.f32.partialorder %v940_v2, 0.0 }
 0x4d2   : > { %v945_v5 = vmul.f32 1.442695, %v943_v3  ;;  %v947_v6 = vmul.f32 1.442695, %v944_v4 }
 0x4d4   : > { %3191 = vpow2.f32 %v945_v5 }
 0x4d5   : > { %3193 = vpow2.f32 %v947_v6 }
 0x4da   : > { %v3192_v8 = vpop.eup %3191 }
 0x4db   : > { %v3194_v10 = vpop.eup %3193  ;;  %v3079_v12 = vadd.f32 -1.0, %v3192_v8 }
 0x4dc   : > { %v3080_v13 = vadd.f32 -1.0, %v3194_v10 }
 0x4dd   : > { %v951_v16 = vsel %vm941_vm11, %v939_v1, %v3079_v12  ;;  %vm1678_vm11 = vcmask 1043459  }
 0x4de   : > { %978 = vmatpush.msra.mxu2 %v951_v16  ;;  %v952_v17 = vsel %vm942_vm12, %v940_v2, %v3080_v13 }
 0x4df   : > { %998 = vmatpush.msra.mxu3 %v952_v17  ;;  %3081 = vmatmul.msk.f32.vlgmr.msra.gmra.mxu2 %vm638_vm8, %v953_v15 }
 0x4e0   : > { %3082 = vmatmul.msk.f32.vlgmr.msra.gmra.mxu3 %vm638_vm8, %v953_v15  ;;  %3091 = vmatpush.msk.msrb.mxu2 %vm543_vm5, %v502_v45  ;;  %v3257_v45 = vmov 1934713408  }
 0x4e1   : > { %3095 = vmatpush.msk.msrb.mxu3 %vm543_vm5, %v503_v43  ;;  %v1077_v11 = vunpack.c.l.s4 %v3257_v45  ;;  %vm1479_vm5 = vcmask 654336  }
 0x4e3   : > { %v3513_v50 = vunpack.c.0.s8 %v1077_v11 }
 0x562   : > { %v980_v9 = vpop.f32.mrf.mxu2 }
 0x563   : > { %v981_v18 = vadd.f32 %v980_v9, %v958_v7  ;;  %v1000_v19 = vpop.f32.mrf.mxu3 }
 0x564   : > { %v1001_v20 = vadd.f32 %v1000_v19, %v958_v7 }
 0x565   : > { %1019 = vrot.lane.b32.xlu2 %v981_v18, %s3249_s29  ;;  %1010 = vrot.lane.b32.xlu0 %v981_v18, %s3250_s30 }
 0x566   : > { %1007 = vrot.lane.b32.xlu1 %v981_v18, %s3251_s8 }
 0x56d   : > { %1013 = vrot.lane.b32.xlu2 %v981_v18, %s3252_s9  ;;  %1004 = vrot.lane.b32.xlu0 %v981_v18, %s3253_s10 }
 0x56e   : > { %1029 = vrot.lane.b32.xlu1 %v1001_v20, %s3251_s8 }
 0x575   : > { %1041 = vrot.lane.b32.xlu2 %v1001_v20, %s3249_s29  ;;  %1032 = vrot.lane.b32.xlu0 %v1001_v20, %s3250_s30 }
 0x576   : > { %1022 = vrot.lane.b32.xlu1 %v981_v18, %s3254_s11 }
 0x57d   : > { %1035 = vrot.lane.b32.xlu2 %v1001_v20, %s3252_s9  ;;  %1026 = vrot.lane.b32.xlu0 %v1001_v20, %s3253_s10 }
 0x57e   : > { %1016 = vrot.lane.b32.xlu1 %v981_v18, %s3255_s12 }
 0x585   : > { %1038 = vrot.lane.b32.xlu0 %v1001_v20, %s3255_s12 }
 0x586   : > { %1044 = vrot.lane.b32.xlu1 %v1001_v20, %s3254_s11 }
 0x5bf   : > { %v1020_v21 = vpop.permute.xlu2 %1019 }
 0x5c0   : > { %v1060_v44 = vrot.slane %v1020_v21, 4 }
 0x5c7   : > { %v1014_v27 = vpop.permute.xlu2 %1013 }
 0x5c8   : > { %v1061_v46 = vsel %vm1048_vm13, %v1060_v44, %v1014_v27 }
 0x5c9   : > { %v1065_v51 = vperm.slane %v1061_v46, %v3508_v34 }
 0x5cb   : > { %v1086_v62 = vrot.slane %v1065_v51, 4 }
 0x5cf   : > { %v1042_v36 = vpop.permute.xlu2 %1041 }
 0x5d0   : > { %v1116_v3 = vrot.slane %v1042_v36, 4 }
 0x5d7   : > { %v1011_v25 = vpop.permute.xlu0 %1010  ;;  %v1036_v63 = vpop.permute.xlu2 %1035 }
 0x5d8   : > { %v1008_v26 = vpop.permute.xlu1 %1007  ;;  %v1054_v33 = vrot.slane %v1011_v25, 4  ;;  %v1117_v8 = vsel %vm1048_vm13, %v1116_v3, %v1036_v63 }
 0x5d9   : > { %v1047_v30 = vrot.slane %v1008_v26, 4  ;;  %v1121_v19 = vperm.slane %v1117_v8, %v3508_v34 }
 0x5db   : > { %v1049_v22 = vsel %vm1048_vm13, %v1047_v30, %v981_v18  ;;  %v1142_v32 = vrot.slane %v1121_v19, 4 }
 0x5dc   : > { %v1053_v38 = vperm.slane %v1049_v22, %v3508_v34 }
 0x5de   : > { %v1074_v48 = vrot.slane %v1053_v38, 4 }
 0x5df   : > { %v1005_v28 = vpop.permute.xlu0 %1004 }
 0x5e0   : > { %v1030_v29 = vpop.permute.xlu1 %1029  ;;  %v1055_v23 = vsel %vm1048_vm13, %v1054_v33, %v1005_v28 }
 0x5e1   : > { %v1059_v42 = vperm.slane %v1055_v23, %v3508_v34  ;;  %v1104_v47 = vrot.slane %v1030_v29, 4 }
 0x5e3   : > { %v1072_v49 = vrot.slane %v1059_v42, 4  ;;  %v1075_v52 = vsel %vm1048_vm13, %v1059_v42, %v1074_v48  ;;  %v1105_v54 = vsel %vm1048_vm13, %v1104_v47, %v1001_v20 }
 0x5e4   : > { %v1083_v61 = vperm.slane %v1075_v52, %v3513_v50  ;;  %v1109_v0 = vperm.slane %v1105_v54, %v3508_v34 }
 0x5e5   : > { %v1073_v59 = vsel %vm1048_vm13, %v1072_v49, %v1053_v38 }
 0x5e6   : > { %v1079_v4 = vperm.slane %v1073_v59, %v3513_v50  ;;  %v1102_v12 = vrot.slane %v1083_v61, 4  ;;  %v1130_v13 = vrot.slane %v1109_v0, 4 }
 0x5e7   : > { %v1033_v35 = vpop.permute.xlu0 %1032 }
 0x5e8   : > { %v1023_v43 = vpop.permute.xlu1 %1022  ;;  %v1110_v53 = vrot.slane %v1033_v35, 4  ;;  %v1098_v18 = vrot.slane %v1079_v4, 4 }
 0x5e9   : > { %v1066_v55 = vrot.slane %v1023_v43, 4 }
 0x5ef   : > { %v1027_v56 = vpop.permute.xlu0 %1026 }
 0x5f0   : > { %v1111_v57 = vsel %vm1048_vm13, %v1110_v53, %v1027_v56  ;;  %v1017_v58 = vpop.permute.xlu1 %1016 }
 0x5f1   : > { %v1067_v60 = vsel %vm1048_vm13, %v1066_v55, %v1017_v58  ;;  %v1115_v1 = vperm.slane %v1111_v57, %v3508_v34 }
 0x5f2   : > { %v1071_v2 = vperm.slane %v1067_v60, %v3508_v34 }
 0x5f3   : > { %v1128_v15 = vrot.slane %v1115_v1, 4  ;;  %v1131_v20 = vsel %vm1048_vm13, %v1115_v1, %v1130_v13 }
 0x5f4   : > { %v1084_v5 = vrot.slane %v1071_v2, 4  ;;  %v1087_v6 = vsel %vm1048_vm13, %v1071_v2, %v1086_v62  ;;  %v1139_v30 = vperm.slane %v1131_v20, %v3513_v50 }
 0x5f5   : > { %v1095_v10 = vperm.slane %v1087_v6, %v3513_v50  ;;  %v1129_v28 = vsel %vm1048_vm13, %v1128_v15, %v1109_v0 }
 0x5f6   : > { %v1085_v16 = vsel %vm1048_vm13, %v1084_v5, %v1065_v51  ;;  %v1135_v22 = vperm.slane %v1129_v28, %v3513_v50  ;;  %v1158_v38 = vrot.slane %v1139_v30, 4 }
 0x5f7   : > { %v1103_v17 = vsel %vm1048_vm13, %v1095_v10, %v1102_v12  ;;  %v1100_v7 = vrot.slane %v1095_v10, 4  ;;  %v1091_v9 = vperm.slane %v1085_v16, %v3513_v50  ;;  %v1039_v29 = vpop.permute.xlu0 %1038 }
 0x5f8   : > { %1262 = vxpose.xlu2.b32.start [1/2] (short) (narrow) %v1103_v17, 16  ;;  %v1045_v21 = vpop.permute.xlu1 %1044  ;;  %v1154_v11 = vrot.slane %v1135_v22, 4 }
 0x5f9   : > { %v1122_v25 = vrot.slane %v1045_v21, 4  ;;  %v1101_v26 = vsel %vm1048_vm13, %v1100_v7, %v1083_v61  ;;  %v1099_v27 = vsel %vm1048_vm13, %v1091_v9, %v1098_v18  ;;  %v1096_v48 = vrot.slane %v1091_v9, 4 }
 0x5fa   : > { %1228 = vxpose.xlu0.b32.start [1/2] (short) (narrow) %v1101_v26, 16  ;;  %1194 = vxpose.xlu1.b32.start [1/2] (short) (narrow) %v1099_v27, 16 }
 0x5fb   : > { %v1123_v31 = vsel %vm1048_vm13, %v1122_v25, %v1039_v29  ;;  %v1097_v49 = vsel %vm1048_vm13, %v1096_v48, %v1079_v4 }
 0x5fc   : > { %v1127_v33 = vperm.slane %v1123_v31, %v3508_v34 }
 0x5fe   : > { %v1140_v23 = vrot.slane %v1127_v33, 4  ;;  %v1143_v35 = vsel %vm1048_vm13, %v1127_v33, %v1142_v32 }
 0x5ff   : > { %v1151_v36 = vperm.slane %v1143_v35, %v3513_v50 }
 0x600   : > { %v1141_v42 = vsel %vm1048_vm13, %v1140_v23, %v1121_v19 }
 0x601   : > { %v1159_v43 = vsel %vm1048_vm13, %v1151_v36, %v1158_v38  ;;  %v1156_v44 = vrot.slane %v1151_v36, 4  ;;  %v1147_v45 = vperm.slane %v1141_v42, %v3513_v50 }
 0x602   : > { %1263 = vxpose.xlu2.b32.end [2/2] (short) (narrow) %v1159_v43, 16 }
 0x603   : > { %v1157_v46 = vsel %vm1048_vm13, %v1156_v44, %v1139_v30  ;;  %v1155_v47 = vsel %vm1048_vm13, %v1147_v45, %v1154_v11  ;;  %v1152_v51 = vrot.slane %v1147_v45, 4 }
 0x604   : > { %1229 = vxpose.xlu0.b32.end [2/2] (short) (narrow) %v1157_v46, 16  ;;  %1195 = vxpose.xlu1.b32.end [2/2] (short) (narrow) %v1155_v47, 16 }
 0x605   : > { %v1153_v52 = vsel %vm1048_vm13, %v1152_v51, %v1135_v22 }
 0x60a   : > { %1160 = vxpose.xlu2.b32.start [1/2] (short) (narrow) %v1097_v49, 16 }
 0x612   : > { %1161 = vxpose.xlu2.b32.end [2/2] (short) (narrow) %v1153_v52, 16 }
 0x693   : > { %v1278_v53 = vpop.trf.xlu2 }
 0x694   : > { %v1294_v57 = vadd.f32 %v1278_v53, %v1103_v17 }
 0x696   : > { %v1302_v0 = vmul.f32 %v1294_v57, %v3351_v14 }
 0x698   : > { %v1316_v10 = vrot.slane %v1302_v0, 4  ;;  %v3586_v48 = vsel %vm395_vm0, %v1302_v0, 0.0 }
 0x69b   : > { %v1279_v54 = vpop.trf.xlu2 }
 0x69c   : > { %v1295_v9 = vadd.f32 %v1279_v54, %v1159_v43 }
 0x69e   : > { %v1303_v29 = vmul.f32 %v1295_v9, %v3368_v24 }
 0x6a0   : > { %v1244_v55 = vpop.trf.xlu0  ;;  %v1210_v56 = vpop.trf.xlu1  ;;  %v3576_v44 = vsel %vm395_vm0, %v1303_v29, 0.0 }
 0x6a1   : > { %v1260_v58 = vadd.f32 %v1244_v55, %v1101_v26  ;;  %v1226_v59 = vadd.f32 %v1210_v56, %v1099_v27 }
 0x6a3   : > { %v1300_v60 = vmul.f32 %v1260_v58, %v3351_v14  ;;  %v1298_v61 = vmul.f32 %v1226_v59, %v3351_v14  ;;  %v1176_v62 = vpop.trf.xlu2 }
 0x6a4   : > { %v1192_v63 = vadd.f32 %v1176_v62, %v1097_v49 }
 0x6a5   : > { %v1624_v1 = vsel %vm395_vm0, %v1298_v61, 0.0  ;;  %v1626_v3 = vsel %vm395_vm0, %v1300_v60, 0.0  ;;  %v1304_v16 = vrot.slane %v1300_v60, 4  ;;  %v1317_v17 = vsel %vm1048_vm13, %v1316_v10, %v1298_v61 }
 0x6a6   : > { %v1296_v2 = vmul.f32 %v1192_v63, %v3351_v14  ;;  %1641 = vadd.xlane.f32.xlu0 %v1624_v1  ;;  %1645 = vadd.xlane.f32.xlu2 %v1626_v3  ;;  %v1318_v18 = vrot.slane %v1298_v61, 4  ;;  %v1323_v25 = vperm.slane %v1317_v17, %v3508_v34 }
 0x6a8   : > { %v1306_v4 = vrot.slane %v1296_v2, 4  ;;  %v1245_v5 = vpop.trf.xlu0  ;;  %v1211_v6 = vpop.trf.xlu1  ;;  %v1623_v8 = vsel %vm395_vm0, %v1296_v2, 0.0  ;;  %v1305_v28 = vsel %vm1048_vm13, %v1304_v16, %v1296_v2  ;;  %v1319_v32 = vsel %vm1048_vm13, %v1302_v0, %v1318_v18 }
 0x6a9   : > { %v1227_v12 = vadd.f32 %v1211_v6, %v1155_v47  ;;  %1637 = vadd.xlane.f32.xlu1 %v1623_v8  ;;  %v1261_v15 = vadd.f32 %v1245_v5, %v1157_v46  ;;  %v1625_v33 = vadd.f32 %v1624_v1, %v1623_v8  ;;  %v1328_v35 = vrot.slane %v1323_v25, 4 }
 0x6aa   : > { %v1307_v13 = vsel %vm1048_vm13, %v1300_v60, %v1306_v4  ;;  %v1311_v36 = vperm.slane %v1305_v28, %v3508_v34  ;;  %v1327_v43 = vperm.slane %v1319_v32, %v3508_v34  ;;  %v1372_v8 = vrot.slane %v1303_v29, 4 }
 0x6ab   : > { %v1177_v7 = vpop.trf.xlu2  ;;  %v1299_v19 = vmul.f32 %v1227_v12, %v3368_v24  ;;  %v1315_v21 = vperm.slane %v1307_v13, %v3508_v34  ;;  %v1301_v26 = vmul.f32 %v1261_v15, %v3368_v24  ;;  %v1627_v45 = vadd.f32 %v1626_v3, %v1625_v33 }
 0x6ac   : > { %v1193_v20 = vadd.f32 %v1177_v7, %v1153_v52  ;;  %v1329_v47 = vsel %vm1048_vm13, %v1328_v35, %v1311_v36  ;;  %v1330_v53 = vrot.slane %v1311_v36, 4  ;;  %v1340_v54 = vrot.slane %v1327_v43, 4 }
 0x6ad   : > { %v1631_v30 = vsel %vm395_vm0, %v1299_v19, 0.0  ;;  %v1342_v23 = vrot.slane %v1315_v21, 4  ;;  %v3571_v38 = vsel %vm395_vm0, %v1301_v26, 0.0  ;;  %v3590_v51 = vadd.f32 %v3586_v48, %v1627_v45  ;;  %v1758_v45 = vld [vmem:[%s4085_s6 + $0xa0] sm:$0xff] }
 0x6ae   : > { %v1297_v27 = vmul.f32 %v1193_v20, %v3368_v24  ;;  %v3593_v52 = vperm.slane %v1329_v47, %v3513_v50  ;;  %v1360_v56 = vrot.slane %v1301_v26, 4  ;;  %v1374_v57 = vrot.slane %v1299_v19, 4 }
 0x6af   : > { %v1343_v46 = vsel %vm1048_vm13, %v1327_v43, %v1342_v23  ;;  %v1331_v58 = vsel %vm1048_vm13, %v1323_v25, %v1330_v53  ;;  %v1341_v59 = vsel %vm1048_vm13, %v1340_v54, %v1315_v21  ;;  %v1373_v12 = vsel %vm1048_vm13, %v1372_v8, %v1299_v19 }
 0x6b0   : > { %v1630_v31 = vsel %vm395_vm0, %v1297_v27, 0.0  ;;  %v1351_v49 = vperm.slane %v1343_v46, %v3513_v50  ;;  %v1352_v55 = vrot.slane %v3593_v52, 4  ;;  %v1362_v60 = vrot.slane %v1297_v27, 4 }
 0x6b1   : > { %1643 = vadd.xlane.f32.xlu1 %v1631_v30  ;;  %1639 = vadd.xlane.f32.xlu2 %v1630_v31  ;;  %v1632_v22 = vadd.f32 %v1631_v30, %v1630_v31  ;;  %v1339_v62 = vperm.slane %v1331_v58, %v3513_v50  ;;  %v1347_v63 = vperm.slane %v1341_v59, %v3513_v50  ;;  %v2060_v58 = vld [vmem:[%s4085_s6 + $0xf0] sm:$0xff] }
 0x6b2   : > { %v1353_v61 = vsel %vm1048_vm13, 0.0, %v1352_v55  ;;  %v1375_v0 = vsel %vm1048_vm13, %v1303_v29, %v1374_v57  ;;  %v1361_v1 = vsel %vm1048_vm13, %v1360_v56, %v1297_v27  ;;  %v1363_v2 = vsel %vm1048_vm13, %v1301_v26, %v1362_v60 }
 0x6b3   : > { %v1634_v42 = vadd.f32 %v3571_v38, %v1632_v22  ;;  %v1367_v3 = vperm.slane %v1361_v1, %v3508_v34  ;;  %v1356_v4 = vrot.slane %v1347_v63, 4  ;;  %v1354_v5 = vrot.slane %v1339_v62, 4 }
 0x6b4   : > { %v1383_v6 = vperm.slane %v1375_v0, %v3508_v34  ;;  %v1371_v10 = vperm.slane %v1363_v2, %v3508_v34  ;;  %v1379_v9 = vperm.slane %v1373_v12, %v3508_v34  ;;  %v1358_v28 = vrot.slane %v1351_v49, 4  ;;  %v2052_v2 = vld [vmem:[%s4085_s6 + $0xe8] sm:$0xff] }
 0x6b5   : > { %v3579_v11 = vadd.f32 %v3576_v44, %v1634_v42  ;;  %v1357_v13 = vsel %vm1048_vm13, 0.0, %v1356_v4  ;;  %v1355_v15 = vsel %vm1048_vm13, 0.0, %v1354_v5  ;;  %v1386_v17 = vrot.slane %v1367_v3, 4 }
 0x6b6   : > { %v1396_v16 = vrot.slane %v1383_v6, 4  ;;  %v1398_v7 = vrot.slane %v1371_v10, 4  ;;  %v1384_v27 = vrot.slane %v1379_v9, 4  ;;  %v1359_v31 = vsel %vm1048_vm13, 0.0, %v1358_v28 }
 0x6b7   : > { %3102 = vmatpush.xpose.msk.msra.mxu2 %vm395_vm0, %v3579_v11  ;;  %v1387_v20 = vsel %vm1048_vm13, %v1379_v9, %v1386_v17  ;;  %v1492_v9 = vld [vmem:[%s4085_s6 + $0x78] sm:$0xff] }
 0x6b8   : > { %v1397_v18 = vsel %vm1048_vm13, %v1396_v16, %v1371_v10  ;;  %v1399_v19 = vsel %vm1048_vm13, %v1383_v6, %v1398_v7  ;;  %v1395_v25 = vperm.slane %v1387_v20, %v3513_v50  ;;  %v1385_v30 = vsel %vm1048_vm13, %v1384_v27, %v1367_v3  ;;  %v504_v7 = vld [vmem:[%s4085_s6 + $0x120] sm:$0xff]  ;;  %v505_v20 = vld [vmem:[%s4085_s6 + $0x128] sm:$0xff] }
 0x6b9   : > { %v1403_v21 = vperm.slane %v1397_v18, %v3513_v50  ;;  %v1407_v26 = vperm.slane %v1399_v19, %v3513_v50  ;;  %v3632_v33 = vperm.slane %v1385_v30, %v3513_v50  ;;  %3092 = vmatmul.msk.f32.vlgmr.msrb.gmra.mxu2 %vm539_vm6, %v504_v7  ;;  %3096 = vmatmul.msk.f32.vlgmr.msrb.gmra.mxu3 %vm539_vm6, %v504_v7  ;;  %v1493_v27 = vld [vmem:[%s4085_s6 + $0x80] sm:$0xff] }
 0x6ba   : > { %1437 = vrot.lane.b32.xlu0 %v1351_v49, %s3251_s8  ;;  %v1410_v42 = vrot.slane %v1395_v25, 4  ;;  %v2044_v49 = vld [vmem:[%s4085_s6 + $0xe0] sm:$0xff] }
 0x6bb   : > { %3103 = vmatpush.xpose.msk.msra.mxu2 %vm395_vm0, %v3590_v51  ;;  %v1414_v29 = vrot.slane %v1407_v26, 4  ;;  %v1412_v22 = vrot.slane %v1403_v21, 4  ;;  %v1408_v23 = vrot.slane %v3632_v33, 4 }
 0x6bc   : > { %v1411_v43 = vsel %vm1048_vm13, 0.0, %v1410_v42  ;;  %v1494_v42 = vld [vmem:[%s4085_s6 + $0x88] sm:$0xf] }
 0x6bd   : > { %v1415_v32 = vsel %vm1048_vm13, 0.0, %v1414_v29  ;;  %v1413_v35 = vsel %vm1048_vm13, 0.0, %v1412_v22  ;;  %v1409_v36 = vsel %vm1048_vm13, 0.0, %v1408_v23  ;;  %v506_v22 = vld [vmem:[%s4085_s6 + $0x130] sm:$0xf] }
 0x6c1   : > { %3093 = vmatmul.msk.f32.gmra.mxu2 %vm539_vm6, %v505_v20  ;;  %3097 = vmatmul.msk.f32.gmra.mxu3 %vm539_vm6, %v505_v20  ;;  %v1771_v20 = vld [vmem:[%s4085_s6 + $0xa8] sm:$0xff] }
 0x6c2   : > { %1417 = vrot.lane.b32.xlu0 %v1353_v61, %s3254_s11  ;;  %v2081_v61 = vld [vmem:[%s4085_s6 + $0x100] sm:$0xf] }
 0x6c9   : > { %1421 = vrot.lane.b32.xlu2 %v1339_v62, %s3249_s29  ;;  %3094 = vmatmul.msk.f32.gmra.mxu2 %vm539_vm6, %v506_v22 }
 0x6ca   : > { %1433 = vrot.lane.b32.xlu1 %v1357_v13, %s3250_s30  ;;  %1425 = vrot.lane.b32.xlu0 %v1355_v15, %s3255_s12 }
 0x6cb   : > { %3098 = vmatmul.msk.f32.gmra.mxu3 %vm539_vm6, %v506_v22  ;;  %vm1676_vm6 = vcmask 1042434  }
 0x6d1   : > { %1429 = vrot.lane.b32.xlu2 %v1347_v63, %s3252_s9  ;;  %v1819_v63 = vld [vmem:[%s4085_s6 + $0xb0] sm:$0xff] }
 0x6d2   : > { %1457 = vrot.lane.b32.xlu0 %v1403_v21, %s3252_s9  ;;  %1449 = vrot.lane.b32.xlu1 %v1395_v25, %s3249_s29 }
 0x6d9   : > { %1441 = vrot.lane.b32.xlu2 %v1359_v31, %s3253_s10 }
 0x6da   : > { %1469 = vrot.lane.b32.xlu0 %v1415_v32, %s3253_s10  ;;  %1465 = vrot.lane.b32.xlu1 %v1407_v26, %s3251_s8 }
 0x6e1   : > { %1461 = vrot.lane.b32.xlu2 %v1413_v35, %s3250_s30 }
 0x6e2   : > { %1445 = vrot.lane.b32.xlu1 %v1409_v36, %s3254_s11 }
 0x6ea   : > { %1453 = vrot.lane.b32.xlu1 %v1411_v43, %s3255_s12 }
 0x704   : > { %1647 = vadd.xlane.f32.xlu0 %v3571_v38  ;;  %v1833_v38 = vld [vmem:[%s4085_s6 + $0xc0] sm:$0xff] }
 0x70a   : > { %1651 = vadd.xlane.f32.xlu2 %v3576_v44 }
 0x714   : > { %1649 = vadd.xlane.f32.xlu1 %v3586_v48 }
 0x718   : > { %1761 = vperm.xlu0 %3181, %v1758_v45  }
 0x719   : > { %v3649_v46 = vpop.xlane.xlu2 %1645  ;;  %v1642_v44 = vpop.xlane.xlu0 %1641 }
 0x71a   : > { %v1666_v54 = vperm.slane %v1642_v44, %v3409_v40  ;;  %v1669_v45 = vperm.slane %v3649_v46, %v3409_v40 }
 0x71c   : > { %v1638_v47 = vpop.xlane.xlu1 %1637 }
 0x71d   : > { %v1663_v55 = vperm.slane %v1638_v47, %v3409_v40 }
 0x720   : > { %2047 = vperm.xlu0 %3181, %v2044_v49   ;;  %v1653_v49 = vld [vmem:[%s4085_s6 + $0x90] sm:$0xff] }
 0x722   : > { %1836 = vperm.xlu2 %3183, %v1833_v38  }
 0x724   : > { %v1644_v48 = vpop.xlane.xlu1 %1643  ;;  %v1640_v53 = vpop.xlane.xlu2 %1639 }
 0x725   : > { %v1667_v56 = vperm.slane %v1644_v48, %v3412_v41  ;;  %v1664_v57 = vperm.slane %v1640_v53, %v3412_v41 }
 0x727   : > { %v1668_v59 = vsel %vm532_vm3, %v1667_v56, %v1666_v54  ;;  %v1665_v60 = vsel %vm532_vm3, %v1664_v57, %v1663_v55  ;;  %v1654_v55 = vld [vmem:[%s4085_s6 + $0x98] sm:$0xff] }
 0x728   : > { %v3670_v62 = vsel %vm537_vm4, %v1668_v59, %v1665_v60  ;;  %2063 = vperm.xlu0 %3181, %v2060_v58   ;;  %vm1477_vm4 = vcmask 523264  }
 0x72a   : > { %2084 = vperm.xlu2 %3183, %v2081_v61  }
 0x72c   : > { %v1438_v0 = vpop.permute.xlu0 %1437  ;;  %v1422_v1 = vpop.permute.xlu2 %1421 }
 0x72d   : > { %1822 = vperm.xlu1 %3182, %v1819_v63  }
 0x734   : > { %v1418_v3 = vpop.permute.xlu0 %1417  ;;  %v1430_v4 = vpop.permute.xlu2 %1429 }
 0x735   : > { %2055 = vperm.xlu1 %3182, %v2052_v2   ;;  %v1472_v5 = vsel %vm395_vm0, %v3593_v52, %v1418_v3 }
 0x736   : > { %v1474_v10 = vsel %vm1473_vm14, %v1472_v5, %v1422_v1 }
 0x73c   : > { %v1434_v6 = vpop.permute.xlu1 %1433  ;;  %v1426_v8 = vpop.permute.xlu0 %1425 }
 0x73d   : > { %v1476_v12 = vsel %vm1475_vm15, %v1474_v10, %v1426_v8  ;;  %v1442_v17 = vpop.permute.xlu2 %1441  ;;  %v1588_v58 = vpop.f32.mrf.mxu2 }
 0x73e   : > { %v1478_v13 = vsel %vm1477_vm4, %v1476_v12, %v1430_v4 }
 0x73f   : > { %v1480_v15 = vsel %vm1479_vm5, %v1478_v13, %v1434_v6 }
 0x740   : > { %v1482_v16 = vsel %vm1481_vm7, %v1480_v15, %v1438_v0 }
 0x741   : > { %v3686_v52 = vsel %vm1483_vm9, %v1482_v16, %v1442_v17 }
 0x742   : > { %3083 = vmatpush.msk.msrb.mxu0 %vm570_vm1, %v3686_v52 }
 0x743   : > { %3084 = vmatmul.msk.f32.vlgmr.msrb.gmra.mxu0 %vm566_vm2, %v1492_v9 }
 0x744   : > { %v1450_v18 = vpop.permute.xlu1 %1449  ;;  %v1458_v25 = vpop.permute.xlu0 %1457 }
 0x745   : > { %v1462_v31 = vpop.permute.xlu2 %1461  ;;  %v1591_v60 = vpop.f32.mrf.mxu2 }
 0x74b   : > { %3085 = vmatmul.msk.f32.gmra.mxu0 %vm566_vm2, %v1493_v27 }
 0x74c   : > { %v1466_v19 = vpop.permute.xlu1 %1465  ;;  %v1470_v23 = vpop.permute.xlu0 %1469 }
 0x74d   : > { %v3773_v10 = vpop.f32.mrf.mxu2 }
 0x753   : > { %3086 = vmatmul.msk.f32.gmra.mxu0 %vm566_vm2, %v1494_v42 }
 0x754   : > { %v1446_v21 = vpop.permute.xlu1 %1445 }
 0x755   : > { %v1485_v26 = vsel %vm395_vm0, %v3632_v33, %v1446_v21 }
 0x756   : > { %v1486_v28 = vsel %vm1473_vm14, %v1485_v26, %v1450_v18  ;;  %v3785_v26 = vld [vmem:[%s4084_s5 + $0x30] sm:$0xff] }
 0x75c   : > { %v1454_v29 = vpop.permute.xlu1 %1453 }
 0x75d   : > { %v1487_v30 = vsel %vm1475_vm15, %v1486_v28, %v1454_v29 }
 0x75e   : > { %v1488_v32 = vsel %vm1477_vm4, %v1487_v30, %v1458_v25 }
 0x75f   : > { %v1489_v33 = vsel %vm1479_vm5, %v1488_v32, %v1462_v31 }
 0x760   : > { %v1490_v35 = vsel %vm1481_vm7, %v1489_v33, %v1466_v19 }
 0x761   : > { %v3721_v36 = vsel %vm1483_vm9, %v1490_v35, %v1470_v23  ;;  %v1832_v35 = vld [vmem:[%s4085_s6 + $0xb8] sm:$0xff] }
 0x762   : > { %3087 = vmatpush.msk.msrb.mxu1 %vm570_vm1, %v3721_v36 }
 0x763   : > { %3088 = vmatmul.msk.f32.vlgmr.msrb.gmra.mxu1 %vm566_vm2, %v1492_v9 }
 0x764   : > { %1723 = vmatpush.msra.mxu1 %v3462_v39 }
 0x76b   : > { %3089 = vmatmul.msk.f32.gmra.mxu1 %vm566_vm2, %v1493_v27  ;;  %v3791_v27 = vld [vmem:[%s4084_s5 + $0x20] sm:$0xff] }
 0x773   : > { %3090 = vmatmul.msk.f32.gmra.mxu1 %vm566_vm2, %v1494_v42 }
 0x777   : > { %v1648_v43 = vpop.xlane.xlu0 %1647 }
 0x778   : > { %v1670_v47 = vperm.slane %v1648_v43, %v3412_v41  ;;  %v3801_v43 = vld [vmem:[%s4084_s5 + $0x18] sm:$0xff] }
 0x77a   : > { %v1671_v39 = vsel %vm532_vm3, %v1670_v47, %v1669_v45  ;;  %v3807_v45 = vld [vmem:[%s4084_s5 + $0x8] sm:$0xff]  ;;  %v3813_v47 = vld [vmem:[%s4084_s5 + $0x38] sm:$0xff] }
 0x77b   : > { %v1677_v38 = vsel %vm1676_vm6, %v1671_v39, %v3670_v62  ;;  %3101 = vmatmul.msk.f32.vlgmr.msra.gmra.mxu1 %vm638_vm8, %v1653_v49  ;;  %v1614_v62 = vpop.f32.mrf.mxu3  ;;  %v3819_v49 = vld [vmem:[%s4084_s5 + $0x28] sm:$0xff] }
 0x77d   : > { %v1652_v44 = vpop.xlane.xlu2 %1651 }
 0x77e   : > { %v1673_v53 = vperm.slane %v1652_v44, %v3412_v41  ;;  %v3230_v41 = vld [vmem:[%s4084_s5] sm:$0xff] }
 0x783   : > { %v1617_v0 = vpop.f32.mrf.mxu3 }
 0x785   : > { %v1837_v39 = vpop.permute.xlu2 %1836 }
 0x787   : > { %v1650_v48 = vpop.xlane.xlu1 %1649 }
 0x788   : > { %v1672_v54 = vperm.slane %v1650_v48, %v3409_v40  ;;  %v3229_v40 = vld [vmem:[%s4084_s5 + $0x10] sm:$0xff] }
 0x78a   : > { %v1674_v46 = vsel %vm532_vm3, %v1673_v53, %v1672_v54  ;;  %v1762_v15 = vpop.permute.xlu0 %1761  ;;  %v3237_v53 = vld [vmem:[%s3334_s19] ss:$0 sm:$0xff] }
 0x78b   : > { %v1679_v56 = vsel %vm1678_vm11, %v1674_v46, %v1677_v38  ;;  %v3779_v21 = vpop.f32.mrf.mxu3  ;;  %v1864_v46 = vld [vmem:[%s4085_s6 + $0xd0] sm:$0xff] }
 0x78c   : > { %3099 = vmatpush.msk.msra.mxu0 %vm570_vm1, %v1679_v56  ;;  %v1912_v56 = vld [vmem:[%s4085_s6 + $0xc8] sm:$0xff] }
 0x78d   : > { %3100 = vmatmul.msk.f32.vlgmr.msra.gmra.mxu0 %vm566_vm2, %v1654_v55  ;;  %v1888_v55 = vld [vmem:[%s4085_s6 + $0xd8] sm:$0xff] }
 0x78e   : > { %3107 = vmatpush.xpose.msk.msrb.mxu0 %vm395_vm0, %v3579_v11 }
 0x792   : > { %3108 = vmatpush.xpose.msk.msrb.mxu0 %vm395_vm0, %v3590_v51 }
 0x796   : > { %1930 = vmatpush.msra.mxu0 %v3229_v40 }
 0x798   : > { %1931 = vmatpush.msra.mxu0 %v3230_v41 }
 0x79f   : > { %v1823_v30 = vpop.permute.xlu1 %1822 }
 0x7c0   : > { %v1527_v57 = vpop.f32.mrf.mxu0 }
 0x7c1   : > { %v3760_v59 = vadd.f32 %v1588_v58, %v1527_v57  ;;  %v2048_v57 = vpop.permute.xlu0 %2047 }
 0x7c8   : > { %v1530_v61 = vpop.f32.mrf.mxu0 }
 0x7c9   : > { %v3762_v11 = vadd.f32 %v1591_v60, %v1530_v61 }
 0x7d0   : > { %v3770_v4 = vpop.f32.mrf.mxu0 }
 0x7e0   : > { %v1553_v51 = vpop.f32.mrf.mxu1 }
 0x7e1   : > { %v3764_v63 = vadd.f32 %v1614_v62, %v1553_v51 }
 0x7e8   : > { %v1556_v1 = vpop.f32.mrf.mxu1 }
 0x7e9   : > { %v3766_v2 = vadd.f32 %v1617_v0, %v1556_v1 }
 0x7f0   : > { %v3768_v3 = vpop.f32.mrf.mxu1 }
 0x7f8   : > { %v1725_v5 = vpop.f32.mrf.mxu1 }
 0x80a   : > { %v1702_v6 = vpop.f32.mrf.mxu0 }
 0x80b   : > { %v1726_v8 = vadd.f32 %v1725_v5, %v1702_v6 }
 0x80d   : > { %3104 = vmatmul.msk.f32.vlgmr.msra.gmra.mxu2 %vm395_vm0, %v1726_v8 }
 0x890   : > { %v1754_v12 = vpop.f32.mrf.mxu2 }
 0x891   : > { %v1757_v13 = vadd.f32 %v1754_v12, %v1726_v8  ;;  %v2056_v12 = vpop.permute.xlu1 %2055 }
 0x893   : > { %v1764_v16 = vadd.f32 %v1762_v15, %v1757_v13 }
 0x895   : > { %v1766_v17 = vmin.f32 %v1764_v16, 0.0  ;;  %vm1765_vm3 = vcmp.gt.f32.partialorder %v1764_v16, 0.0 }
 0x897   : > { %v1767_v7 = vmul.f32 1.442695, %v1766_v17 }
 0x899   : > { %3195 = vpow2.f32 %v1767_v7 }
 0x89f   : > { %v3196_v9 = vpop.eup %3195 }
 0x8a0   : > { %v3105_v18 = vadd.f32 -1.0, %v3196_v9 }
 0x8a2   : > { %v1770_v19 = vsel %vm1765_vm3, %v1764_v16, %v3105_v18  ;;  %v2064_v16 = vpop.permute.xlu0 %2063 }
 0x8a3   : > { %1790 = vmatpush.msra.mxu3 %v1770_v19 }
 0x8a4   : > { %3106 = vmatmul.msk.f32.vlgmr.msra.gmra.mxu3 %vm638_vm8, %v1771_v20 }
 0x927   : > { %v1792_v25 = vpop.f32.mrf.mxu3 }
 0x928   : > { %3109 = vmatmul.msk.f32.vlgmr.msrb.gmra.mxu0 %vm395_vm0, %v1792_v25 }
 0x929   : > { %2016 = vmatpush.msrb.mxu0 %v3785_v26 }
 0x92b   : > { %2017 = vmatpush.msrb.mxu0 %v3791_v27 }
 0x9a5   : > { %v1815_v28 = vpop.f32.mrf.mxu0 }
 0x9a6   : > { %v1818_v29 = vadd.f32 %v1815_v28, %v1792_v25 }
 0x9a8   : > { %v1825_v31 = vadd.f32 %v1823_v30, %v1818_v29 }
 0x9aa   : > { %v1827_v32 = vmin.f32 %v1825_v31, 0.0  ;;  %vm1826_vm12 = vcmp.gt.f32.partialorder %v1825_v31, 0.0 }
 0x9ac   : > { %v1828_v22 = vmul.f32 1.442695, %v1827_v32 }
 0x9ae   : > { %3197 = vpow2.f32 %v1828_v22 }
 0x9b4   : > { %v3198_v33 = vpop.eup %3197 }
 0x9b5   : > { %v3110_v23 = vadd.f32 -1.0, %v3198_v33  ;;  %v2085_v33 = vpop.permute.xlu2 %2084 }
 0x9b7   : > { %v1831_v42 = vsel %vm1826_vm12, %v1825_v31, %v3110_v23  ;;  %v2080_v31 = vld [vmem:[%s4085_s6 + $0xf8] sm:$0xf] }
 0x9b8   : > { %1857 = vmatpush.msrb.mxu1 %v1831_v42 }
 0x9b9   : > { %3111 = vmatmul.msk.f32.vlgmr.msrb.gmra.mxu1 %vm638_vm8, %v1832_v35 }
 0x9ba   : > { %1950 = vmatpush.msra.mxu1 %v3801_v43 }
 0x9bc   : > { %1951 = vmatpush.msra.mxu1 %v3807_v45 }
 0x9be   : > { %2036 = vmatpush.msrb.mxu1 %v3813_v47 }
 0x9c0   : > { %2037 = vmatpush.msrb.mxu1 %v3819_v49 }
 0xa36   : > { %v1859_v38 = vpop.f32.mrf.mxu1 }
 0xa37   : > { %v1860_v44 = vadd.f32 %v1859_v38, %v1837_v39 }
 0xa39   : > { %3199 = vtanh.f32 %v1860_v44 }
 0xa3f   : > { %v3200_v48 = vpop.eup %3199 }
 0xa40   : > { %v1863_v54 = vmul.f32 %v3237_v53, %v3200_v48 }
 0xa42   : > { %1883 = vmatpush.msrb.mxu2 %v1863_v54  ;;  %1907 = vmatpush.msrb.mxu3 %v1863_v54 }
 0xa43   : > { %3112 = vmatmul.msk.f32.vlgmr.msrb.gmra.mxu2 %vm638_vm8, %v1864_v46  ;;  %3113 = vmatmul.msk.f32.vlgmr.msrb.gmra.mxu3 %vm638_vm8, %v1888_v55 }
 0xa44   : > { %3118 = vmatpush.msk.msra.mxu3 %vm570_vm1, %v3721_v36  ;;  %3116 = vmatpush.msk.msra.mxu2 %vm570_vm1, %v3686_v52 }
 0xa4b   : > { %3117 = vmatmul.msk.f32.vlgmr.msra.gmra.mxu2 %vm566_vm2, %v1912_v56  ;;  %3119 = vmatmul.msk.f32.vlgmr.msra.gmra.mxu3 %vm566_vm2, %v1912_v56 }
 0xac6   : > { %v1885_v40 = vpop.f32.mrf.mxu2  ;;  %v1909_v41 = vpop.f32.mrf.mxu3 }
 0xac7   : > { %3114 = vmatmul.msk.f32.vlgmr.msra.gmra.mxu0 %vm395_vm0, %v1885_v40  ;;  %3115 = vmatmul.msk.f32.vlgmr.msra.gmra.mxu1 %vm395_vm0, %v1885_v40 }
 0xace   : > { %v1976_v58 = vpop.f32.mrf.mxu2  ;;  %v1996_v60 = vpop.f32.mrf.mxu3 }
 0xacf   : > { %3120 = vmatmul.msk.f32.vlgmr.msrb.gmra.mxu0 %vm395_vm0, %v1909_v41  ;;  %3121 = vmatmul.msk.f32.vlgmr.msrb.gmra.mxu1 %vm395_vm0, %v1909_v41 }
 0xb44   : > { %v1933_v52 = vpop.f32.mrf.mxu0  ;;  %v1953_v36 = vpop.f32.mrf.mxu1 }
 0xb45   : > { %v1977_v61 = vadd.f32 %v1976_v58, %v1933_v52  ;;  %v1997_v62 = vadd.f32 %v1996_v60, %v1953_v36 }
 0xb4c   : > { %v2019_v51 = vpop.f32.mrf.mxu0  ;;  %v2039_v0 = vpop.f32.mrf.mxu1 }
 0xb4d   : > { %v2042_v1 = vadd.f32 %v2019_v51, %v1977_v61  ;;  %v2043_v5 = vadd.f32 %v2039_v0, %v1997_v62 }
 0xb4f   : > { %v2050_v6 = vadd.f32 %v2048_v57, %v2042_v1  ;;  %v2051_v8 = vadd.f32 %v2048_v57, %v2043_v5 }
 0xb51   : > { %v2058_v13 = vmul.f32 %v2056_v12, %v2050_v6  ;;  %v2059_v15 = vmul.f32 %v2056_v12, %v2051_v8 }
 0xb53   : > { %v2066_v17 = vadd.f32 %v2064_v16, %v2058_v13  ;;  %v2067_v7 = vadd.f32 %v2064_v16, %v2059_v15 }
 0xb55   : > { %v2070_v9 = vmin.f32 %v2066_v17, 0.0  ;;  %v2071_v18 = vmin.f32 %v2067_v7, 0.0  ;;  %vm2068_vm6 = vcmp.gt.f32.partialorder %v2066_v17, 0.0  ;;  %vm2069_vm11 = vcmp.gt.f32.partialorder %v2067_v7, 0.0 }
 0xb57   : > { %v2072_v20 = vmul.f32 1.442695, %v2070_v9  ;;  %v2074_v19 = vmul.f32 1.442695, %v2071_v18 }
 0xb59   : > { %3201 = vpow2.f32 %v2072_v20 }
 0xb5a   : > { %3203 = vpow2.f32 %v2074_v19 }
 0xb5f   : > { %v3202_v25 = vpop.eup %3201 }
 0xb60   : > { %v3204_v28 = vpop.eup %3203  ;;  %v3122_v29 = vadd.f32 -1.0, %v3202_v25 }
 0xb61   : > { %v3123_v30 = vadd.f32 -1.0, %v3204_v28 }
 0xb62   : > { %v2078_v32 = vsel %vm2068_vm6, %v2066_v17, %v3122_v29 }
 0xb63   : > { %2105 = vmatpush.msrb.mxu2 %v2078_v32  ;;  %v2079_v22 = vsel %vm2069_vm11, %v2067_v7, %v3123_v30 }
 0xb64   : > { %2125 = vmatpush.msrb.mxu3 %v2079_v22  ;;  %3124 = vmatmul.msk.f32.vlgmr.msrb.gmra.mxu2 %vm638_vm8, %v2080_v31 }
 0xb65   : > { %3125 = vmatmul.msk.f32.vlgmr.msrb.gmra.mxu3 %vm638_vm8, %v2080_v31 }
 0xbe7   : > { %v2107_v23 = vpop.f32.mrf.mxu2 }
 0xbe8   : > { %v2108_v35 = vadd.f32 %v2107_v23, %v2085_v33  ;;  %v2127_v42 = vpop.f32.mrf.mxu3 }
 0xbe9   : > { %v2128_v39 = vadd.f32 %v2127_v42, %v2085_v33 }
 0xbea   : > { %2146 = vrot.lane.b32.xlu2 %v2108_v35, %s3249_s29  ;;  %2137 = vrot.lane.b32.xlu0 %v2108_v35, %s3250_s30 }
 0xbeb   : > { %2134 = vrot.lane.b32.xlu1 %v2108_v35, %s3251_s8 }
 0xbf2   : > { %2140 = vrot.lane.b32.xlu2 %v2108_v35, %s3252_s9  ;;  %2131 = vrot.lane.b32.xlu0 %v2108_v35, %s3253_s10 }
 0xbf3   : > { %2156 = vrot.lane.b32.xlu1 %v2128_v39, %s3251_s8 }
 0xbfa   : > { %2168 = vrot.lane.b32.xlu2 %v2128_v39, %s3249_s29  ;;  %2159 = vrot.lane.b32.xlu0 %v2128_v39, %s3250_s30 }
 0xbfb   : > { %2149 = vrot.lane.b32.xlu1 %v2108_v35, %s3254_s11 }
 0xc02   : > { %2162 = vrot.lane.b32.xlu2 %v2128_v39, %s3252_s9  ;;  %2153 = vrot.lane.b32.xlu0 %v2128_v39, %s3253_s10 }
 0xc03   : > { %2143 = vrot.lane.b32.xlu1 %v2108_v35, %s3255_s12 }
 0xc0a   : > { %2165 = vrot.lane.b32.xlu0 %v2128_v39, %s3255_s12 }
 0xc0b   : > { %2171 = vrot.lane.b32.xlu1 %v2128_v39, %s3254_s11 }
 0xc44   : > { %v2147_v38 = vpop.permute.xlu2 %2146 }
 0xc45   : > { %v2186_v61 = vrot.slane %v2147_v38, 4 }
 0xc4c   : > { %v2141_v53 = vpop.permute.xlu2 %2140 }
 0xc4d   : > { %v2187_v62 = vsel %vm1048_vm13, %v2186_v61, %v2141_v53 }
 0xc4e   : > { %v2191_v5 = vperm.slane %v2187_v62, %v3508_v34 }
 0xc50   : > { %v2212_v20 = vrot.slane %v2191_v5, 4 }
 0xc54   : > { %v2169_v36 = vpop.permute.xlu2 %2168 }
 0xc55   : > { %v2242_v30 = vrot.slane %v2169_v36, 4 }
 0xc5c   : > { %v2138_v44 = vpop.permute.xlu0 %2137  ;;  %v2163_v19 = vpop.permute.xlu2 %2162 }
 0xc5d   : > { %v2135_v48 = vpop.permute.xlu1 %2134  ;;  %v2180_v56 = vrot.slane %v2138_v44, 4  ;;  %v2243_v33 = vsel %vm1048_vm13, %v2242_v30, %v2163_v19 }
 0xc5e   : > { %v2174_v55 = vrot.slane %v2135_v48, 4 }
 0xc60   : > { %v2175_v40 = vsel %vm1048_vm13, %v2174_v55, %v2108_v35 }
 0xc61   : > { %v2179_v57 = vperm.slane %v2175_v40, %v3508_v34 }
 0xc63   : > { %v2200_v0 = vrot.slane %v2179_v57, 4 }
 0xc64   : > { %v2132_v54 = vpop.permute.xlu0 %2131 }
 0xc65   : > { %v2157_v46 = vpop.permute.xlu1 %2156  ;;  %v2181_v41 = vsel %vm1048_vm13, %v2180_v56, %v2132_v54 }
 0xc66   : > { %v2185_v58 = vperm.slane %v2181_v41, %v3508_v34  ;;  %v2230_v51 = vrot.slane %v2157_v46, 4  ;;  %v2247_v46 = vperm.slane %v2243_v33, %v3508_v34 }
 0xc68   : > { %v2198_v1 = vrot.slane %v2185_v58, 4  ;;  %v2201_v6 = vsel %vm1048_vm13, %v2185_v58, %v2200_v0  ;;  %v2231_v12 = vsel %vm1048_vm13, %v2230_v51, %v2128_v39  ;;  %v2268_v61 = vrot.slane %v2247_v46, 4 }
 0xc69   : > { %v2209_v9 = vperm.slane %v2201_v6, %v3513_v50  ;;  %v2235_v25 = vperm.slane %v2231_v12, %v3508_v34 }
 0xc6a   : > { %v2199_v16 = vsel %vm1048_vm13, %v2198_v1, %v2179_v57 }
 0xc6b   : > { %v2205_v31 = vperm.slane %v2199_v16, %v3513_v50  ;;  %v2228_v35 = vrot.slane %v2209_v9, 4  ;;  %v2256_v42 = vrot.slane %v2235_v25, 4 }
 0xc6c   : > { %v2160_v52 = vpop.permute.xlu0 %2159 }
 0xc6d   : > { %v2150_v60 = vpop.permute.xlu1 %2149  ;;  %v2236_v8 = vrot.slane %v2160_v52, 4  ;;  %v2224_v54 = vrot.slane %v2205_v31, 4 }
 0xc6e   : > { %v2192_v13 = vrot.slane %v2150_v60, 4 }
 0xc74   : > { %v2154_v15 = vpop.permute.xlu0 %2153 }
 0xc75   : > { %v2237_v17 = vsel %vm1048_vm13, %v2236_v8, %v2154_v15  ;;  %v2144_v7 = vpop.permute.xlu1 %2143 }
 0xc76   : > { %v2193_v18 = vsel %vm1048_vm13, %v2192_v13, %v2144_v7  ;;  %v2241_v28 = vperm.slane %v2237_v17, %v3508_v34 }
 0xc77   : > { %v2197_v29 = vperm.slane %v2193_v18, %v3508_v34 }
 0xc78   : > { %v2254_v39 = vrot.slane %v2241_v28, 4  ;;  %v2257_v55 = vsel %vm1048_vm13, %v2241_v28, %v2256_v42 }
 0xc79   : > { %v2210_v32 = vrot.slane %v2197_v29, 4  ;;  %v2213_v22 = vsel %vm1048_vm13, %v2197_v29, %v2212_v20  ;;  %v2265_v58 = vperm.slane %v2257_v55, %v3513_v50 }
 0xc7a   : > { %v2221_v23 = vperm.slane %v2213_v22, %v3513_v50  ;;  %v2255_v36 = vsel %vm1048_vm13, %v2254_v39, %v2235_v25 }
 0xc7b   : > { %v2211_v38 = vsel %vm1048_vm13, %v2210_v32, %v2191_v5  ;;  %v2261_v51 = vperm.slane %v2255_v36, %v3513_v50  ;;  %v2284_v6 = vrot.slane %v2265_v58, 4 }
 0xc7c   : > { %v2229_v44 = vsel %vm1048_vm13, %v2221_v23, %v2228_v35  ;;  %v2226_v48 = vrot.slane %v2221_v23, 4  ;;  %v2217_v53 = vperm.slane %v2211_v38, %v3513_v50  ;;  %v2166_v57 = vpop.permute.xlu0 %2165 }
 0xc7d   : > { %2388 = vxpose.xlu2.b32.start [1/2] (short) (narrow) %v2229_v44, 16  ;;  %v2172_v56 = vpop.permute.xlu1 %2171  ;;  %v2280_v16 = vrot.slane %v2261_v51, 4 }
 0xc7e   : > { %v2248_v40 = vrot.slane %v2172_v56, 4  ;;  %v2227_v41 = vsel %vm1048_vm13, %v2226_v48, %v2209_v9  ;;  %v2225_v52 = vsel %vm1048_vm13, %v2217_v53, %v2224_v54  ;;  %v2222_v9 = vrot.slane %v2217_v53, 4 }
 0xc7f   : > { %2354 = vxpose.xlu0.b32.start [1/2] (short) (narrow) %v2227_v41, 16  ;;  %2320 = vxpose.xlu1.b32.start [1/2] (short) (narrow) %v2225_v52, 16 }
 0xc80   : > { %v2249_v60 = vsel %vm1048_vm13, %v2248_v40, %v2166_v57  ;;  %v2223_v18 = vsel %vm1048_vm13, %v2222_v9, %v2205_v31 }
 0xc81   : > { %v2253_v62 = vperm.slane %v2249_v60, %v3508_v34 }
 0xc83   : > { %v2266_v0 = vrot.slane %v2253_v62, 4  ;;  %v2269_v1 = vsel %vm1048_vm13, %v2253_v62, %v2268_v61 }
 0xc84   : > { %v2277_v5 = vperm.slane %v2269_v1, %v3513_v50 }
 0xc85   : > { %v2267_v8 = vsel %vm1048_vm13, %v2266_v0, %v2247_v46 }
 0xc86   : > { %v2285_v12 = vsel %vm1048_vm13, %v2277_v5, %v2284_v6  ;;  %v2282_v13 = vrot.slane %v2277_v5, 4  ;;  %v2273_v15 = vperm.slane %v2267_v8, %v3513_v50 }
 0xc87   : > { %2389 = vxpose.xlu2.b32.end [2/2] (short) (narrow) %v2285_v12, 16 }
 0xc88   : > { %v2283_v17 = vsel %vm1048_vm13, %v2282_v13, %v2265_v58  ;;  %v2281_v7 = vsel %vm1048_vm13, %v2273_v15, %v2280_v16  ;;  %v2278_v20 = vrot.slane %v2273_v15, 4 }
 0xc89   : > { %2355 = vxpose.xlu0.b32.end [2/2] (short) (narrow) %v2283_v17, 16  ;;  %2321 = vxpose.xlu1.b32.end [2/2] (short) (narrow) %v2281_v7, 16 }
 0xc8a   : > { %v2279_v19 = vsel %vm1048_vm13, %v2278_v20, %v2261_v51 }
 0xc8f   : > { %2286 = vxpose.xlu2.b32.start [1/2] (short) (narrow) %v2223_v18, 16 }
 0xc97   : > { %2287 = vxpose.xlu2.b32.end [2/2] (short) (narrow) %v2279_v19, 16 }
 0xd18   : > { %v2404_v25 = vpop.trf.xlu2 }
 0xd19   : > { %v2420_v28 = vadd.f32 %v2404_v25, %v2229_v44 }
 0xd1b   : > { %v2428_v30 = vmul.f32 %v2420_v28, %v3351_v14 }
 0xd1d   : > { %v2442_v35 = vrot.slane %v2428_v30, 4 }
 0xd20   : > { %v2405_v29 = vpop.trf.xlu2 }
 0xd21   : > { %v2421_v46 = vadd.f32 %v2405_v29, %v2285_v12 }
 0xd23   : > { %v2429_v51 = vmul.f32 %v2421_v46, %v3368_v24 }
 0xd25   : > { %v2370_v32 = vpop.trf.xlu0  ;;  %v2336_v22 = vpop.trf.xlu1  ;;  %v2498_v25 = vrot.slane %v2429_v51, 4 }
 0xd26   : > { %v2386_v33 = vadd.f32 %v2370_v32, %v2227_v41  ;;  %v2352_v23 = vadd.f32 %v2336_v22, %v2225_v52 }
 0xd28   : > { %v2426_v42 = vmul.f32 %v2386_v33, %v3351_v14  ;;  %v2424_v39 = vmul.f32 %v2352_v23, %v3351_v14  ;;  %v2302_v31 = vpop.trf.xlu2 }
 0xd29   : > { %v2318_v38 = vadd.f32 %v2302_v31, %v2223_v18 }
 0xd2a   : > { %v2430_v48 = vrot.slane %v2426_v42, 4  ;;  %v2443_v53 = vsel %vm1048_vm13, %v2442_v35, %v2424_v39  ;;  %v2444_v54 = vrot.slane %v2424_v39, 4 }
 0xd2b   : > { %v2449_v44 = vperm.slane %v2443_v53, %v3508_v34  ;;  %v2422_v55 = vmul.f32 %v2318_v38, %v3351_v14 }
 0xd2c   : > { %v2445_v56 = vsel %vm1048_vm13, %v2428_v30, %v2444_v54 }
 0xd2d   : > { %v3911_v40 = vperm.slane %v2445_v56, %v3508_v34  ;;  %v2454_v41 = vrot.slane %v2449_v44, 4  ;;  %v2431_v52 = vsel %vm1048_vm13, %v2430_v48, %v2422_v55  ;;  %v2432_v36 = vrot.slane %v2422_v55, 4  ;;  %v2371_v57 = vpop.trf.xlu0  ;;  %v2337_v58 = vpop.trf.xlu1 }
 0xd2e   : > { %v2437_v60 = vperm.slane %v2431_v52, %v3508_v34  ;;  %v2387_v61 = vadd.f32 %v2371_v57, %v2283_v17  ;;  %v2353_v62 = vadd.f32 %v2337_v58, %v2281_v7 }
 0xd2f   : > { %v2433_v0 = vsel %vm1048_vm13, %v2426_v42, %v2432_v36  ;;  %v2466_v14 = vrot.slane %v3911_v40, 4 }
 0xd30   : > { %v2427_v1 = vmul.f32 %v2387_v61, %v3368_v24  ;;  %v2425_v5 = vmul.f32 %v2353_v62, %v3368_v24  ;;  %v2303_v6 = vpop.trf.xlu2  ;;  %v2441_v8 = vperm.slane %v2433_v0, %v3508_v34  ;;  %v2456_v12 = vrot.slane %v2437_v60, 4 }
 0xd31   : > { %v2319_v13 = vadd.f32 %v2303_v6, %v2279_v19  ;;  %v2455_v15 = vsel %vm1048_vm13, %v2454_v41, %v2437_v60 }
 0xd32   : > { %v2486_v16 = vrot.slane %v2427_v1, 4  ;;  %v2500_v17 = vrot.slane %v2425_v5, 4  ;;  %v2467_v7 = vsel %vm1048_vm13, %v2466_v14, %v2441_v8  ;;  %v2457_v20 = vsel %vm1048_vm13, %v2449_v44, %v2456_v12 }
 0xd33   : > { %v2423_v9 = vmul.f32 %v2319_v13, %v3368_v24  ;;  %v2473_v18 = vperm.slane %v2467_v7, %v3513_v50  ;;  %v2465_v29 = vperm.slane %v2457_v20, %v3513_v50  ;;  %v3929_v30 = vperm.slane %v2455_v15, %v3513_v50  ;;  %v2689_v7 = vld [vmem:[%s4085_s6 + $0x140] sm:$0xff]  ;;  %v2752_v20 = vld [vmem:[%s4085_s6 + $0x170] sm:$0xff] }
 0xd34   : > { %v2501_v28 = vsel %vm1048_vm13, %v2429_v51, %v2500_v17  ;;  %v2499_v24 = vsel %vm1048_vm13, %v2498_v25, %v2425_v5  ;;  %v2468_v57 = vrot.slane %v2441_v8, 4  ;;  %v2690_v17 = vld [vmem:[%s4085_s6 + $0x148] sm:$0xf] }
 0xd35   : > { %v2487_v19 = vsel %vm1048_vm13, %v2486_v16, %v2423_v9  ;;  %v2488_v32 = vrot.slane %v2423_v9, 4  ;;  %2555 = vrot.lane.b32.xlu1 %v2473_v18, %s3252_s9  ;;  %v2482_v22 = vrot.slane %v2473_v18, 4  ;;  %2547 = vrot.lane.b32.xlu0 %v2465_v29, %s3249_s29  ;;  %v2509_v23 = vperm.slane %v2501_v28, %v3508_v34  ;;  %v2688_v16 = vld [vmem:[%s4085_s6 + $0x138] sm:$0xff]  ;;  %v2751_v9 = vld [vmem:[%s4085_s6 + $0x168] sm:$0xff] }
 0xd36   : > { %v2493_v33 = vperm.slane %v2487_v19, %v3508_v34  ;;  %v2478_v31 = vrot.slane %v3929_v30, 4  ;;  %v2505_v48 = vperm.slane %v2499_v24, %v3508_v34  ;;  %v2480_v53 = vrot.slane %v2465_v29, 4  ;;  %v2753_v18 = vld [vmem:[%s4085_s6 + $0x178] sm:$0xf]  ;;  %v2874_v25 = vld [vmem:[%s4085_s6 + $0x188] sm:$0x1] }
 0xd37   : > { %v2489_v35 = vsel %vm1048_vm13, %v2427_v1, %v2488_v32  ;;  %v2483_v42 = vsel %vm1048_vm13, 0.0, %v2482_v22  ;;  %v2522_v54 = vrot.slane %v2509_v23, 4  ;;  %v2469_v51 = vsel %vm1048_vm13, %v3911_v40, %v2468_v57 }
 0xd38   : > { %v2497_v39 = vperm.slane %v2489_v35, %v3508_v34  ;;  %2559 = vrot.lane.b32.xlu2 %v2483_v42, %s3250_s30  ;;  %v2512_v38 = vrot.slane %v2493_v33, 4  ;;  %v2479_v44 = vsel %vm1048_vm13, 0.0, %v2478_v31  ;;  %v2481_v56 = vsel %vm1048_vm13, 0.0, %v2480_v53 }
 0xd39   : > { %v2510_v52 = vrot.slane %v2505_v48, 4  ;;  %v2477_v1 = vperm.slane %v2469_v51, %v3513_v50  ;;  %v2614_v51 = vld [vmem:[%s4085_s6 + $0x118] sm:$0xf] }
 0xd3a   : > { %v2513_v46 = vsel %vm1048_vm13, %v2505_v48, %v2512_v38  ;;  %v2523_v55 = vsel %vm1048_vm13, %v2522_v54, %v2497_v39  ;;  %v2524_v41 = vrot.slane %v2497_v39, 4 }
 0xd3b   : > { %v2521_v36 = vperm.slane %v2513_v46, %v3513_v50  ;;  %v2529_v34 = vperm.slane %v2523_v55, %v3513_v50  ;;  %v2511_v60 = vsel %vm1048_vm13, %v2510_v52, %v2493_v33  ;;  %v2484_v8 = vrot.slane %v2477_v1, 4  ;;  %v2612_v52 = vld [vmem:[%s4085_s6 + $0x108] sm:$0xff] }
 0xd3c   : > { %v2525_v58 = vsel %vm1048_vm13, %v2509_v23, %v2524_v41  ;;  %v2517_v0 = vperm.slane %v2511_v60, %v3513_v50 }
 0xd3d   : > { %2543 = vrot.lane.b32.xlu1 %v2479_v44, %s3254_s11  ;;  %2551 = vrot.lane.b32.xlu0 %v2481_v56, %s3255_s12  ;;  %v2538_v61 = vrot.slane %v2529_v34, 4  ;;  %v2533_v62 = vperm.slane %v2525_v58, %v3513_v50  ;;  %v2536_v5 = vrot.slane %v2521_v36, 4  ;;  %v2485_v13 = vsel %vm1048_vm13, 0.0, %v2484_v8 }
 0xd3e   : > { %v2534_v6 = vrot.slane %v2517_v0, 4 }
 0xd3f   : > { %v2539_v14 = vsel %vm1048_vm13, 0.0, %v2538_v61  ;;  %v2537_v12 = vsel %vm1048_vm13, 0.0, %v2536_v5  ;;  %v2540_v15 = vrot.slane %v2533_v62, 4 }
 0xd40   : > { %2575 = vrot.lane.b32.xlu2 %v2521_v36, %s3249_s29  ;;  %v2535_v40 = vsel %vm1048_vm13, 0.0, %v2534_v6 }
 0xd41   : > { %v2541_v50 = vsel %vm1048_vm13, 0.0, %v2540_v15 }
 0xd45   : > { %2583 = vrot.lane.b32.xlu1 %v2529_v34, %s3252_s9  ;;  %2591 = vrot.lane.b32.xlu0 %v2533_v62, %s3251_s8  ;;  %v2613_v62 = vld [vmem:[%s4085_s6 + $0x110] sm:$0xff] }
 0xd48   : > { %2587 = vrot.lane.b32.xlu2 %v2539_v14, %s3250_s30 }
 0xd4d   : > { %2579 = vrot.lane.b32.xlu1 %v2537_v12, %s3255_s12  ;;  %2571 = vrot.lane.b32.xlu0 %v2535_v40, %s3254_s11 }
 0xd50   : > { %2567 = vrot.lane.b32.xlu2 %v2485_v13, %s3253_s10 }
 0xd55   : > { %2595 = vrot.lane.b32.xlu1 %v2541_v50, %s3253_s10  ;;  %2563 = vrot.lane.b32.xlu0 %v2477_v1, %s3251_s8 }
 0xd58   : > { %2693 = vperm.xlu2 %3183, %v2688_v16  }
 0xd5d   : > { %2703 = vperm.xlu1 %3182, %v2690_v17   ;;  %2698 = vperm.xlu0 %3181, %v2689_v7  }
 0xd60   : > { %2756 = vperm.xlu2 %3183, %v2751_v9  }
 0xd65   : > { %2766 = vperm.xlu1 %3182, %v2753_v18   ;;  %2761 = vperm.xlu0 %3181, %v2752_v20   ;;  %v1621_v18 = vadd.f32 %v3779_v21, %v3768_v3 }
 0xd6d   : > { %2877 = vperm.xlu1 %3182, %v2874_v25  }
 0xd92   : > { %v2560_v19 = vpop.permute.xlu2 %2559 }
 0xd9a   : > { %v2576_v24 = vpop.permute.xlu2 %2575 }
 0xda2   : > { %v2588_v42 = vpop.permute.xlu2 %2587 }
 0xda7   : > { %v2556_v28 = vpop.permute.xlu1 %2555  ;;  %v2548_v29 = vpop.permute.xlu0 %2547 }
 0xdaa   : > { %v2568_v58 = vpop.permute.xlu2 %2567 }
 0xdaf   : > { %v2544_v32 = vpop.permute.xlu1 %2543  ;;  %v2552_v22 = vpop.permute.xlu0 %2551 }
 0xdb0   : > { %v2598_v35 = vsel %vm395_vm0, %v3929_v30, %v2544_v32 }
 0xdb1   : > { %v2599_v39 = vsel %vm1473_vm14, %v2598_v35, %v2548_v29 }
 0xdb2   : > { %v2600_v53 = vsel %vm1475_vm15, %v2599_v39, %v2552_v22  ;;  %v2694_v6 = vpop.permute.xlu2 %2693 }
 0xdb3   : > { %v2601_v56 = vsel %vm1477_vm4, %v2600_v53, %v2556_v28 }
 0xdb4   : > { %v2602_v57 = vsel %vm1479_vm5, %v2601_v56, %v2560_v19 }
 0xdb7   : > { %v2584_v33 = vpop.permute.xlu1 %2583  ;;  %v2592_v23 = vpop.permute.xlu0 %2591 }
 0xdbf   : > { %v2580_v31 = vpop.permute.xlu1 %2579  ;;  %v2572_v38 = vpop.permute.xlu0 %2571 }
 0xdc0   : > { %v2605_v48 = vsel %vm395_vm0, %v2517_v0, %v2572_v38 }
 0xdc1   : > { %v2606_v54 = vsel %vm1473_vm14, %v2605_v48, %v2576_v24 }
 0xdc2   : > { %v2607_v46 = vsel %vm1475_vm15, %v2606_v54, %v2580_v31  ;;  %vm2769_vm15 = vcmask 162816  }
 0xdc3   : > { %v2608_v44 = vsel %vm1477_vm4, %v2607_v46, %v2584_v33 }
 0xdc4   : > { %v2609_v55 = vsel %vm1479_vm5, %v2608_v44, %v2588_v42 }
 0xdc5   : > { %v2610_v41 = vsel %vm1481_vm7, %v2609_v55, %v2592_v23 }
 0xdc7   : > { %v2596_v30 = vpop.permute.xlu1 %2595  ;;  %v2564_v34 = vpop.permute.xlu0 %2563 }
 0xdc8   : > { %v2611_v36 = vsel %vm1483_vm9, %v2610_v41, %v2596_v30  ;;  %v2603_v60 = vsel %vm1481_vm7, %v2602_v57, %v2564_v34  ;;  %v2748_v34 = vld [vmem:[%s4085_s6 + $0x150] sm:$0xff] }
 0xdc9   : > { %3130 = vmatpush.msk.msra.mxu1 %vm570_vm1, %v2611_v36  ;;  %v2604_v61 = vsel %vm1483_vm9, %v2603_v60, %v2568_v58 }
 0xdca   : > { %3131 = vmatmul.msk.f32.vlgmr.msra.gmra.mxu1 %vm566_vm2, %v2612_v52  ;;  %3126 = vmatpush.msk.msra.mxu0 %vm570_vm1, %v2604_v61  ;;  %v2749_v61 = vld [vmem:[%s4085_s6 + $0x158] sm:$0xff] }
 0xdcb   : > { %3127 = vmatmul.msk.f32.vlgmr.msra.gmra.mxu0 %vm566_vm2, %v2612_v52 }
 0xdcf   : > { %v2699_v12 = vpop.permute.xlu0 %2698  ;;  %v2704_v29 = vpop.permute.xlu1 %2703 }
 0xdd2   : > { %3132 = vmatmul.msk.f32.gmra.mxu1 %vm566_vm2, %v2613_v62 }
 0xdd3   : > { %3128 = vmatmul.msk.f32.gmra.mxu0 %vm566_vm2, %v2613_v62  ;;  %v2750_v62 = vld [vmem:[%s4085_s6 + $0x160] sm:$0xf] }
 0xdda   : > { %3133 = vmatmul.msk.f32.gmra.mxu1 %vm566_vm2, %v2614_v51 }
 0xddb   : > { %3129 = vmatmul.msk.f32.gmra.mxu0 %vm566_vm2, %v2614_v51 }
 0xe47   : > { %v2673_v0 = vpop.f32.mrf.mxu1 }
 0xe48   : > { %v2647_v14 = vpop.f32.mrf.mxu0  ;;  %v2683_v1 = vadd.f32 %v2673_v0, %v3764_v63 }
 0xe49   : > { %v2682_v13 = vadd.f32 %v2647_v14, %v3760_v59  ;;  %v2757_v14 = vpop.permute.xlu2 %2756 }
 0xe4a   : > { %v2707_v40 = vadd.f32 %v2694_v6, %v2683_v1  ;;  %v2762_v1 = vpop.permute.xlu0 %2761 }
 0xe4b   : > { %v2706_v9 = vadd.f32 %v2694_v6, %v2682_v13 }
 0xe4c   : > { %v2719_v7 = vmin.f32 %v2707_v40, 0.0  ;;  %vm2713_vm14 = vcmp.gt.f32.partialorder %v2707_v40, 0.0 }
 0xe4d   : > { %v2718_v59 = vmin.f32 %v2706_v9, 0.0  ;;  %vm2712_vm4 = vcmp.gt.f32.partialorder %v2706_v9, 0.0 }
 0xe4e   : > { %v2726_v19 = vmul.f32 1.442695, %v2719_v7 }
 0xe4f   : > { %v2676_v5 = vpop.f32.mrf.mxu1  ;;  %v2724_v42 = vmul.f32 1.442695, %v2718_v59 }
 0xe50   : > { %v2685_v8 = vadd.f32 %v2676_v5, %v3766_v2  ;;  %v2650_v15 = vpop.f32.mrf.mxu0  ;;  %v1595_v2 = vadd.f32 %v3773_v10, %v3770_v4  ;;  %3205 = vpow2.f32 %v2726_v19 }
 0xe51   : > { %v2684_v16 = vadd.f32 %v2650_v15, %v3762_v11 }
 0xe52   : > { %v2709_v50 = vadd.f32 %v2699_v12, %v2685_v8 }
 0xe53   : > { %v2708_v17 = vadd.f32 %v2699_v12, %v2684_v16 }
 0xe54   : > { %v2721_v20 = vmin.f32 %v2709_v50, 0.0  ;;  %vm2715_vm8 = vcmp.gt.f32.partialorder %v2709_v50, 0.0 }
 0xe55   : > { %v2720_v63 = vmin.f32 %v2708_v17, 0.0  ;;  %vm2714_vm13 = vcmp.gt.f32.partialorder %v2708_v17, 0.0 }
 0xe56   : > { %v2730_v22 = vmul.f32 1.442695, %v2721_v20  ;;  %v3206_v4 = vpop.eup %3205 }
 0xe57   : > { %v2679_v25 = vpop.f32.mrf.mxu1  ;;  %v2728_v33 = vmul.f32 1.442695, %v2720_v63  ;;  %v3135_v30 = vadd.f32 -1.0, %v3206_v4 }
 0xe58   : > { %v2687_v28 = vadd.f32 %v2679_v25, %v1621_v18  ;;  %v2653_v32 = vpop.f32.mrf.mxu0  ;;  %3207 = vpow2.f32 %v2730_v22 }
 0xe59   : > { %v2686_v11 = vadd.f32 %v2653_v32, %v1595_v2  ;;  %3209 = vpow2.f32 %v2728_v33  ;;  %v2743_v58 = vsel %vm2713_vm14, %v2707_v40, %v3135_v30  ;;  %v354_v30 = vmul.f32 %v3819_v49, %v3807_v45 }
 0xe5a   : > { %v2711_v24 = vadd.f32 %v2704_v29, %v2687_v28 }
 0xe5b   : > { %v2710_v35 = vadd.f32 %v2704_v29, %v2686_v11 }
 0xe5c   : > { %v2723_v23 = vmin.f32 %v2711_v24, 0.0  ;;  %vm2717_vm0 = vcmp.gt.f32.partialorder %v2711_v24, 0.0 }
 0xe5d   : > { %v2722_v21 = vmin.f32 %v2710_v35, 0.0  ;;  %vm2716_vm2 = vcmp.gt.f32.partialorder %v2710_v35, 0.0 }
 0xe5e   : > { %v2734_v3 = vmul.f32 1.442695, %v2723_v23  ;;  %v3208_v10 = vpop.eup %3207 }
 0xe5f   : > { %v2732_v39 = vmul.f32 1.442695, %v2722_v21  ;;  %v3210_v31 = vpop.eup %3209  ;;  %v3137_v54 = vadd.f32 -1.0, %v3208_v10 }
 0xe60   : > { %3211 = vpow2.f32 %v2734_v3  ;;  %v3136_v56 = vadd.f32 -1.0, %v3210_v31 }
 0xe61   : > { %3213 = vpow2.f32 %v2724_v42  ;;  %v2745_v52 = vsel %vm2715_vm8, %v2709_v50, %v3137_v54  ;;  %v2873_v54 = vld [vmem:[%s4085_s6 + $0x180] sm:$0x1] }
 0xe62   : > { %3215 = vpow2.f32 %v2732_v39  ;;  %v2744_v57 = vsel %vm2714_vm13, %v2708_v17, %v3136_v56  ;;  %v2767_v17 = vpop.permute.xlu1 %2766  ;;  %v356_v56 = vmul.f32 %v3813_v47, %v3801_v43 }
 0xe66   : > { %v3212_v38 = vpop.eup %3211 }
 0xe67   : > { %v3214_v48 = vpop.eup %3213  ;;  %v3139_v53 = vadd.f32 -1.0, %v3212_v38 }
 0xe68   : > { %v3216_v46 = vpop.eup %3215  ;;  %v3134_v36 = vadd.f32 -1.0, %v3214_v48 }
 0xe69   : > { %v3138_v44 = vadd.f32 -1.0, %v3216_v46  ;;  %v2747_v55 = vsel %vm2717_vm0, %v2711_v24, %v3139_v53 }
 0xe6a   : > { %3144 = vmatpush.msk.msra.mxu3 %vm570_vm1, %v2747_v55  ;;  %v2742_v60 = vsel %vm2712_vm4, %v2706_v9, %v3134_v36  ;;  %v3239_v36 = vld [vmem:[%s4084_s5] sm:$0xff] }
 0xe6b   : > { %v2746_v41 = vsel %vm2716_vm2, %v2710_v35, %v3138_v44 }
 0xe6c   : > { %3140 = vmatpush.msk.msra.mxu2 %vm570_vm1, %v2746_v41  ;;  %2825 = vmatpush.msra.mxu3 %v2745_v52  ;;  %v3238_v41 = vld [vmem:[%s4084_s5 + $0x10] sm:$0xff] }
 0xe6d   : > { %v355_v52 = vmul.f32 %v3238_v41, %v3785_v26 }
 0xe6e   : > { %2799 = vmatpush.msra.mxu2 %v2744_v57  ;;  %2826 = vmatpush.msra.mxu3 %v2743_v58  ;;  %v364_v57 = vadd.f32 %v356_v56, %v354_v30 }
 0xe6f   : > { %3145 = vmatmul.msk.f32.vlgmr.msra.gmra.mxu3 %vm2769_vm15, %v2748_v34 }
 0xe70   : > { %2800 = vmatpush.msra.mxu2 %v2742_v60  ;;  %v365_v60 = vrot.slane %v364_v57, 4 }
 0xe71   : > { %3141 = vmatmul.msk.f32.vlgmr.msra.gmra.mxu2 %vm2769_vm15, %v2748_v34  ;;  %v353_v34 = vmul.f32 %v3239_v36, %v3791_v27 }
 0xe72   : > { %v366_v43 = vadd.f32 %v365_v60, %v364_v57 }
 0xe73   : > { %v357_v58 = vadd.f32 %v355_v52, %v353_v34 }
 0xe77   : > { %3146 = vmatmul.msk.f32.gmra.mxu3 %vm2769_vm15, %v2749_v61 }
 0xe79   : > { %3142 = vmatmul.msk.f32.gmra.mxu2 %vm2769_vm15, %v2749_v61  ;;  %v358_v61 = vrot.slane %v357_v58, 4 }
 0xe7b   : > { %v359_v47 = vadd.f32 %v358_v61, %v357_v58 }
 0xe7d   : > { %v360_v45 = vrot.slane %v359_v47, 2 }
 0xe7f   : > { %3147 = vmatmul.msk.f32.gmra.mxu3 %vm2769_vm15, %v2750_v62 }
 0xe81   : > { %3143 = vmatmul.msk.f32.gmra.mxu2 %vm2769_vm15, %v2750_v62  ;;  %v367_v62 = vrot.slane %v366_v43, 2 }
 0xe83   : > { %v368_v49 = vadd.f32 %v367_v62, %v366_v43 }
 0xef2   : > { %v2828_v51 = vpop.f32.mrf.mxu3 }
 0xef3   : > { %v2829_v5 = vadd.f32 %v2828_v51, %v2757_v14  ;;  %v361_v51 = vadd.f32 %v360_v45, %v359_v47 }
 0xef4   : > { %v2802_v0 = vpop.f32.mrf.mxu2 }
 0xef5   : > { %v2844_v13 = vmin.f32 %v2829_v5, 0.0  ;;  %v2803_v15 = vadd.f32 %v2802_v0, %v2757_v14  ;;  %vm2838_vm12 = vcmp.gt.f32.partialorder %v2829_v5, 0.0  ;;  %v369_v0 = vrot.slane %v368_v49, 1 }
 0xef6   : > { %v362_v14 = vrot.slane %v361_v51, 1 }
 0xef7   : > { %v2851_v7 = vmul.f32 1.442695, %v2844_v13  ;;  %v2843_v9 = vmin.f32 %v2803_v15, 0.0  ;;  %vm2837_vm6 = vcmp.gt.f32.partialorder %v2803_v15, 0.0  ;;  %v370_v26 = vadd.f32 %v369_v0, %v368_v49 }
 0xef9   : > { %3217 = vpow2.f32 %v2851_v7  ;;  %v2849_v19 = vmul.f32 1.442695, %v2843_v9 }
 0xefa   : > { %v2831_v6 = vpop.f32.mrf.mxu3 }
 0xefb   : > { %v2832_v8 = vadd.f32 %v2831_v6, %v2762_v1  ;;  %v2878_v6 = vpop.permute.xlu1 %2877 }
 0xefc   : > { %v2805_v12 = vpop.f32.mrf.mxu2 }
 0xefd   : > { %v2806_v40 = vadd.f32 %v2805_v12, %v2762_v1  ;;  %v2846_v50 = vmin.f32 %v2832_v8, 0.0  ;;  %vm2840_vm9 = vcmp.gt.f32.partialorder %v2832_v8, 0.0  ;;  %v363_v1 = vadd.f32 %v362_v14, %v361_v51 }
 0xeff   : > { %v2845_v16 = vmin.f32 %v2806_v40, 0.0  ;;  %v2855_v20 = vmul.f32 1.442695, %v2846_v50  ;;  %v3218_v24 = vpop.eup %3217  ;;  %vm2839_vm3 = vcmp.gt.f32.partialorder %v2806_v40, 0.0  ;;  %v371_v27 = vsub.f32 1.0, %v363_v1 }
 0xf00   : > { %v3149_v31 = vadd.f32 -1.0, %v3218_v24 }
 0xf01   : > { %v2853_v25 = vmul.f32 1.442695, %v2845_v16  ;;  %3219 = vpow2.f32 %v2855_v20 }
 0xf02   : > { %v2834_v18 = vpop.f32.mrf.mxu3  ;;  %v2868_v44 = vsel %vm2838_vm12, %v2829_v5, %v3149_v31  ;;  %v372_v5 = vsub.f32 1.0, %v370_v26 }
 0xf03   : > { %v2835_v63 = vadd.f32 %v2834_v18, %v2767_v17  ;;  %3221 = vpow2.f32 %v2853_v25 }
 0xf04   : > { %v2808_v2 = vpop.f32.mrf.mxu2 }
 0xf05   : > { %v2848_v28 = vmin.f32 %v2835_v63, 0.0  ;;  %v2809_v29 = vadd.f32 %v2808_v2, %v2767_v17  ;;  %vm2842_vm5 = vcmp.gt.f32.partialorder %v2835_v63, 0.0 }
 0xf07   : > { %v2859_v59 = vmul.f32 1.442695, %v2848_v28  ;;  %v2847_v32 = vmin.f32 %v2809_v29, 0.0  ;;  %v3220_v11 = vpop.eup %3219  ;;  %vm2841_vm7 = vcmp.gt.f32.partialorder %v2809_v29, 0.0 }
 0xf08   : > { %v3151_v3 = vadd.f32 -1.0, %v3220_v11 }
 0xf09   : > { %3223 = vpow2.f32 %v2859_v59  ;;  %v2857_v22 = vmul.f32 1.442695, %v2847_v32  ;;  %v3222_v33 = vpop.eup %3221 }
 0xf0a   : > { %3225 = vpow2.f32 %v2849_v19  ;;  %v3150_v10 = vadd.f32 -1.0, %v3222_v33  ;;  %v2870_v48 = vsel %vm2840_vm9, %v2832_v8, %v3151_v3 }
 0xf0b   : > { %3227 = vpow2.f32 %v2857_v22 }
 0xf0c   : > { %v2869_v46 = vsel %vm2839_vm3, %v2806_v40, %v3150_v10 }
 0xf0f   : > { %v3224_v23 = vpop.eup %3223 }
 0xf10   : > { %v3226_v35 = vpop.eup %3225  ;;  %v3153_v42 = vadd.f32 -1.0, %v3224_v23 }
 0xf11   : > { %v3228_v21 = vpop.eup %3227  ;;  %v3148_v53 = vadd.f32 -1.0, %v3226_v35 }
 0xf12   : > { %v2872_v39 = vsel %vm2842_vm5, %v2835_v63, %v3153_v42  ;;  %v3152_v4 = vadd.f32 -1.0, %v3228_v21 }
 0xf13   : > { %3156 = vmatpush.msk.msrb.mxu1 %vm570_vm1, %v2872_v39  ;;  %v2867_v55 = vsel %vm2837_vm6, %v2803_v15, %v3148_v53 }
 0xf14   : > { %v2871_v38 = vsel %vm2841_vm7, %v2809_v29, %v3152_v4 }
 0xf15   : > { %3154 = vmatpush.msk.msrb.mxu0 %vm570_vm1, %v2871_v38  ;;  %2923 = vmatpush.msrb.mxu1 %v2870_v48  ;;  %vm2938_vm1 = vcmp.lt.s32.totalorder %v527_v37, 256 }
 0xf17   : > { %2903 = vmatpush.msrb.mxu0 %v2869_v46  ;;  %2924 = vmatpush.msrb.mxu1 %v2868_v44 }
 0xf18   : > { %3157 = vmatmul.msk.f32.vlgmr.msrb.gmra.mxu1 %vm2769_vm15, %v2873_v54 }
 0xf19   : > { %2904 = vmatpush.msrb.mxu0 %v2867_v55 }
 0xf1a   : > { %3155 = vmatmul.msk.f32.vlgmr.msrb.gmra.mxu0 %vm2769_vm15, %v2873_v54 }
 0xf95   : > { %v2926_v8 = vpop.f32.mrf.mxu1 }
 0xf96   : > { %v2927_v12 = vadd.f32 %v2926_v8, %v2878_v6 }
 0xf97   : > { %v2906_v40 = vpop.f32.mrf.mxu0 }
 0xf98   : > { %v2930_v13 = vmul.f32 %v2927_v12, %v372_v5  ;;  %v2907_v15 = vadd.f32 %v2906_v40, %v2878_v6 }
 0xf9a   : > { %v2933_v50 = vrot.slane %v2930_v13, 7  ;;  %v2929_v16 = vmul.f32 %v2907_v15, %v371_v27 }
 0xf9c   : > { %v2934_v17 = vsel %vm497_vm10, %v2929_v16, %v2933_v50 }
 0xf9d   : > { %2940 = vst.msk [vmem:[%s344_s18] sm:$0x3] %vm2938_vm1, %v2934_v17 }
 0xf9e PF: > { %s17_s24 = sadd.s32 1, %s3246_s24  }
 0xf9f   : > { %p14_p4 = scmp.ge.s32.totalorder %s17_s24, 4  }
 0xfa1   :  { %16 = sbr.rel (!%p14_p4) target bundleno = 1 (0x1), region = 90 }

</bundles_post_ra>
